<compile_context>
chip_gen: v7x
topology: tpu7x:2x2x1
jax: 0.10.0
libtpu: 0.0.40
codegen_flags: <defaults>
</compile_context>

<pallas_src>
import functools

import jax
import jax.numpy as jnp
from jax.experimental import pallas as pl
from jax.experimental.pallas import tpu as pltpu

LAYER_NORM_EPS = 1e-12


def _layer_norm(x, w, b):
    mu = jnp.mean(x, axis=-1, keepdims=True)
    var = jnp.mean(jnp.square(x - mu), axis=-1, keepdims=True)
    return (x - mu) * jax.lax.rsqrt(var + LAYER_NORM_EPS) * w + b


def _mm(x2, w2):
    """[M, K] @ [K, N]: bf16 MXU inputs, f32 accumulation."""
    return jnp.dot(x2.astype(jnp.bfloat16), w2.astype(jnp.bfloat16),
                   preferred_element_type=jnp.float32)


def reformer_block_kernel(x_ref,
                          wqkv_ref, wo_ref,
                          w1_ref, b1_ref, w2_ref, b2_ref,
                          ln_attn_w_ref, ln_attn_b_ref,
                          ln_ff_w_ref, ln_ff_b_ref,
                          ln_out_w_ref, ln_out_b_ref,
                          u_ref,
                          out_ref,
                          attn_scr, hid_scr,
                          *, n_heads, p_drop):
    l = pl.program_id(1)
    n_layers = pl.num_programs(1)

    S = x_ref.shape[1]
    H = x_ref.shape[2]
    dH = H // n_heads
    scale = 1.0 / (dH ** 0.5)

    # ---- initialize the two reversible streams at the first layer ---------
    @pl.when(l == 0)
    def _():
        x = x_ref[...].astype(jnp.float32)          # (1, S, H)
        attn_scr[...] = x                           # stream 1 (attn_out)
        hid_scr[...] = x                            # stream 2 (hidden)

    attn_out = attn_scr[...]                        # (1, S, H) f32
    hidden = hid_scr[...]                           # (1, S, H) f32

    # ---- attention sub-layer (acts on `hidden`) ----------------------------
    h_ln = _layer_norm(hidden, ln_attn_w_ref[...], ln_attn_b_ref[...])
    qkv = _mm(h_ln.reshape(S, H), wqkv_ref[0])      # (S, 3H), one fused matmul

    q = (qkv[:, :H] * scale).reshape(S, n_heads, dH)
    k = qkv[:, H:2 * H].reshape(S, n_heads, dH)
    v = qkv[:, 2 * H:].reshape(S, n_heads, dH)
    qh = jnp.swapaxes(q, 0, 1)                      # (nH, S, dH)
    kh = jnp.swapaxes(k, 0, 1)
    vh = jnp.swapaxes(v, 0, 1)

    # all heads at once
    s = jnp.einsum('hqd,hkd->hqk',
                   qh.astype(jnp.bfloat16), kh.astype(jnp.bfloat16),
                   preferred_element_type=jnp.float32)      # (nH, S, S)
    m = jnp.max(s, axis=-1, keepdims=True)
    e = jnp.exp(s - m)
    p = e / jnp.sum(e, axis=-1, keepdims=True)              # softmax (f32)
    ctx = jnp.einsum('hqk,hkd->hqd',
                     p.astype(jnp.bfloat16), vh.astype(jnp.bfloat16),
                     preferred_element_type=jnp.float32)    # (nH, S, dH)
    ctx = jnp.swapaxes(ctx, 0, 1).reshape(S, H)

    attn_proj = _mm(ctx, wo_ref[0])                 # single full-width Wo matmul
    attn_out = attn_out + attn_proj.reshape(1, S, H)

    # ---- chunked feed-forward sub-layer (acts on updated attn_out) ---------
    a_ln = _layer_norm(attn_out, ln_ff_w_ref[...], ln_ff_b_ref[...])
    ff = jnp.maximum(_mm(a_ln.reshape(S, H), w1_ref[0]) + b1_ref[0], 0.0)
    ff = _mm(ff, w2_ref[0]) + b2_ref[0]
    hidden = hidden + ff.reshape(1, S, H)

    # carry streams to the next layer iteration
    attn_scr[...] = attn_out
    hid_scr[...] = hidden

    # ---- epilogue at the last layer: LN over 2H + dropout, one wide store --
    @pl.when(l == n_layers - 1)
    def _():
        cat = jnp.concatenate([attn_out, hidden], axis=-1)   # (1, S, 2H)
        y = _layer_norm(cat, ln_out_w_ref[...], ln_out_b_ref[...])
        if p_drop > 0.0:
            keep = u_ref[...] >= p_drop
            y = jnp.where(keep, y * (1.0 / (1.0 - p_drop)), 0.0)
        out_ref[...] = y.astype(out_ref.dtype)


def reformer_block(x, params, *, n_heads, p_drop=0.05, training=True, rng=None):
    B, S, H = x.shape
    L = params['wqkv'].shape[0]
    FF = params['w1'].shape[-1]
    H2 = 2 * H

    if rng is None:
        rng = jax.random.PRNGKey(0)
    # uniform randoms for inverted dropout (one value per output element)
    u = jax.random.uniform(rng, (B, S, H2), jnp.float32)

    kernel = functools.partial(reformer_block_kernel,
                               n_heads=n_heads,
                               p_drop=float(p_drop) if training else 0.0)

    def bmap(b, l):   # blocks indexed by batch, resident across layers
        return (b, 0, 0)

    def lmap(b, l):   # per-layer weight blocks -> streamed / double-buffered
        return (l, 0, 0)

    def zmap(b, l):   # shared (layer-independent) params
        return (0, 0, 0)

    in_specs = [
        pl.BlockSpec((1, S, H), bmap),          # x
        pl.BlockSpec((1, H, 3 * H), lmap),      # wqkv
        pl.BlockSpec((1, H, H), lmap),          # wo
        pl.BlockSpec((1, H, FF), lmap),         # w1
        pl.BlockSpec((1, 1, FF), lmap),         # b1
        pl.BlockSpec((1, FF, H), lmap),         # w2
        pl.BlockSpec((1, 1, H), lmap),          # b2
        pl.BlockSpec((1, 1, H), lmap),          # ln_attn_w
        pl.BlockSpec((1, 1, H), lmap),          # ln_attn_b
        pl.BlockSpec((1, 1, H), lmap),          # ln_ff_w
        pl.BlockSpec((1, 1, H), lmap),          # ln_ff_b
        pl.BlockSpec((1, 1, H2), zmap),         # ln_out_w
        pl.BlockSpec((1, 1, H2), zmap),         # ln_out_b
        pl.BlockSpec((1, S, H2), bmap),         # dropout randoms
    ]
    out_spec = pl.BlockSpec((1, S, H2), bmap)

    # explicit VMEM budget: double-buffered per-layer weights + headroom
    lw_keys = ('wqkv', 'wo', 'w1', 'b1', 'w2', 'b2',
               'ln_attn_w', 'ln_attn_b', 'ln_ff_w', 'ln_ff_b')
    per_layer_bytes = sum(int(params[k][0].size) * params[k].dtype.itemsize
                          for k in lw_keys)
    vmem_limit = int(min(max(4 * per_layer_bytes + (4 << 20), 16 << 20),
                         100 << 20))

    out = pl.pallas_call(
        kernel,
        out_shape=jax.ShapeDtypeStruct((B, S, H2), jnp.float32),
        grid=(B, L),
        in_specs=in_specs,
        out_specs=out_spec,
        scratch_shapes=[pltpu.VMEM((1, S, H), jnp.float32),   # attn stream
                        pltpu.VMEM((1, S, H), jnp.float32)],  # hidden stream
        compiler_params=pltpu.CompilerParams(
            dimension_semantics=("parallel", "arbitrary"),
            vmem_limit_bytes=vmem_limit),
    )(x,
      params['wqkv'], params['wo'],
      params['w1'], params['b1'], params['w2'], params['b2'],
      params['ln_attn_w'], params['ln_attn_b'],
      params['ln_ff_w'], params['ln_ff_b'],
      params['ln_out_w'], params['ln_out_b'],
      u)
    return out


def init_params(key, hidden, ff, n_layers):
    ks = jax.random.split(key, 6)
    std = 0.02
    H = hidden

    def nrm(k, shape):
        # matmul weights stored in bf16 (MXU inputs); stats/bias params in f32
        return (jax.random.normal(k, shape, jnp.float32) * std).astype(jnp.bfloat16)

    wq = nrm(ks[0], (n_layers, H, H))
    wk = nrm(ks[1], (n_layers, H, H))
    wv = nrm(ks[2], (n_layers, H, H))

    return dict(
        wqkv=jnp.concatenate([wq, wk, wv], axis=-1),        # [L, H, 3H]
        wo=nrm(ks[3], (n_layers, H, H)),
        w1=nrm(ks[4], (n_layers, H, ff)),
        b1=jnp.zeros((n_layers, 1, ff), jnp.float32),
        w2=nrm(ks[5], (n_layers, ff, H)),
        b2=jnp.zeros((n_layers, 1, H), jnp.float32),
        ln_attn_w=jnp.ones((n_layers, 1, H), jnp.float32),
        ln_attn_b=jnp.zeros((n_layers, 1, H), jnp.float32),
        ln_ff_w=jnp.ones((n_layers, 1, H), jnp.float32),
        ln_ff_b=jnp.zeros((n_layers, 1, H), jnp.float32),
        # final LayerNorm over 2*hidden
        ln_out_w=jnp.ones((1, 1, 2 * H), jnp.float32),
        ln_out_b=jnp.zeros((1, 1, 2 * H), jnp.float32),
    )


if __name__ == "__main__":
    # small config consistent with the module: hidden=32, ff=64, 2 layers, 4 heads
    B, S, H, FF, L, NH = 2, 8, 32, 64, 2, 4
    key = jax.random.PRNGKey(0)
    kx, kp, kd = jax.random.split(key, 3)
    x = jax.random.normal(kx, (B, S, H), jnp.float32)
    params = init_params(kp, H, FF, L)

    out = reformer_block(x, params, n_heads=NH, p_drop=0.05, training=True, rng=kd)
    out = jax.block_until_ready(out)

    assert out.shape == (B, S, 2 * H), out.shape
    assert bool(jnp.all(jnp.isfinite(out)))
    print("KERNEL_OK")
</pallas_src>

<mosaic_0001>
module attributes {stable_mosaic.version = 11 : i64} {
  func.func @reformer_block_kernel(%arg0: i32, %arg1: i32, %arg2: memref<1x8x32xf32, #tpu.memory_space<vmem>>, %arg3: memref<1x32x96xbf16, #tpu.memory_space<vmem>>, %arg4: memref<1x32x32xbf16, #tpu.memory_space<vmem>>, %arg5: memref<1x32x64xbf16, #tpu.memory_space<vmem>>, %arg6: memref<1x1x64xf32, #tpu.memory_space<vmem>>, %arg7: memref<1x64x32xbf16, #tpu.memory_space<vmem>>, %arg8: memref<1x1x32xf32, #tpu.memory_space<vmem>>, %arg9: memref<1x1x32xf32, #tpu.memory_space<vmem>>, %arg10: memref<1x1x32xf32, #tpu.memory_space<vmem>>, %arg11: memref<1x1x32xf32, #tpu.memory_space<vmem>>, %arg12: memref<1x1x32xf32, #tpu.memory_space<vmem>>, %arg13: memref<1x1x64xf32, #tpu.memory_space<vmem>>, %arg14: memref<1x1x64xf32, #tpu.memory_space<vmem>>, %arg15: memref<1x8x64xf32, #tpu.memory_space<vmem>>, %arg16: memref<1x8x64xf32, #tpu.memory_space<vmem>>, %arg17: memref<1x8x32xf32, #tpu.memory_space<vmem>>, %arg18: memref<1x8x32xf32, #tpu.memory_space<vmem>>) attributes {dimension_semantics = [#tpu.dimension_semantics<parallel>, #tpu.dimension_semantics<arbitrary>], iteration_bounds = array<i64: 2, 2>, scalar_prefetch = 0 : i64, scratch_operands = 2 : i64, tpu.core_type = #tpu.core_type<tc>, window_params = [{transform_indices = @transform_0, window_bounds = array<i64: 1, 8, 32>}, {transform_indices = @transform_1, window_bounds = array<i64: 1, 32, 96>}, {transform_indices = @transform_2, window_bounds = array<i64: 1, 32, 32>}, {transform_indices = @transform_3, window_bounds = array<i64: 1, 32, 64>}, {transform_indices = @transform_4, window_bounds = array<i64: 1, 1, 64>}, {transform_indices = @transform_5, window_bounds = array<i64: 1, 64, 32>}, {transform_indices = @transform_6, window_bounds = array<i64: 1, 1, 32>}, {transform_indices = @transform_7, window_bounds = array<i64: 1, 1, 32>}, {transform_indices = @transform_8, window_bounds = array<i64: 1, 1, 32>}, {transform_indices = @transform_9, window_bounds = array<i64: 1, 1, 32>}, {transform_indices = @transform_10, window_bounds = array<i64: 1, 1, 32>}, {pipeline_mode = #tpu.pipeline_mode<synchronous>, transform_indices = @transform_11, window_bounds = array<i64: 1, 1, 64>}, {pipeline_mode = #tpu.pipeline_mode<synchronous>, transform_indices = @transform_12, window_bounds = array<i64: 1, 1, 64>}, {transform_indices = @transform_13, window_bounds = array<i64: 1, 8, 64>}, {transform_indices = @transform_14, window_bounds = array<i64: 1, 8, 64>}]} {
    %c0_i32 = arith.constant 0 : i32
    %0 = arith.cmpi eq, %arg1, %c0_i32 : i32
    %1 = arith.extui %0 : i1 to i32
    %c0_i32_0 = arith.constant 0 : i32
    %2 = arith.cmpi ne, %1, %c0_i32_0 : i32
    scf.if %2 {
      %c0_62 = arith.constant 0 : index
      %c0_63 = arith.constant 0 : index
      %c0_64 = arith.constant 0 : index
      %118 = vector.load %arg2[%c0_62, %c0_63, %c0_64] : memref<1x8x32xf32, #tpu.memory_space<vmem>>, vector<1x8x32xf32>
      %c0_65 = arith.constant 0 : index
      %c0_66 = arith.constant 0 : index
      %c0_67 = arith.constant 0 : index
      %119 = vector.load %arg17[%c0_65, %c0_66, %c0_67] : memref<1x8x32xf32, #tpu.memory_space<vmem>>, vector<1x8x32xf32>
      tpu.vector_store %arg17[%c0_65, %c0_66, %c0_67], %118 {strides = array<i32>} : memref<1x8x32xf32, #tpu.memory_space<vmem>>, vector<1x8x32xf32>,
      %c0_68 = arith.constant 0 : index
      %c0_69 = arith.constant 0 : index
      %c0_70 = arith.constant 0 : index
      %120 = vector.load %arg18[%c0_68, %c0_69, %c0_70] : memref<1x8x32xf32, #tpu.memory_space<vmem>>, vector<1x8x32xf32>
      tpu.vector_store %arg18[%c0_68, %c0_69, %c0_70], %118 {strides = array<i32>} : memref<1x8x32xf32, #tpu.memory_space<vmem>>, vector<1x8x32xf32>,
    } else {
    }
    %c0 = arith.constant 0 : index
    %c0_1 = arith.constant 0 : index
    %c0_2 = arith.constant 0 : index
    %3 = vector.load %arg17[%c0, %c0_1, %c0_2] : memref<1x8x32xf32, #tpu.memory_space<vmem>>, vector<1x8x32xf32>
    %c0_3 = arith.constant 0 : index
    %c0_4 = arith.constant 0 : index
    %c0_5 = arith.constant 0 : index
    %4 = vector.load %arg18[%c0_3, %c0_4, %c0_5] : memref<1x8x32xf32, #tpu.memory_space<vmem>>, vector<1x8x32xf32>
    %c0_6 = arith.constant 0 : index
    %c0_7 = arith.constant 0 : index
    %c0_8 = arith.constant 0 : index
    %5 = vector.load %arg9[%c0_6, %c0_7, %c0_8] : memref<1x1x32xf32, #tpu.memory_space<vmem>>, vector<1x1x32xf32>
    %c0_9 = arith.constant 0 : index
    %c0_10 = arith.constant 0 : index
    %c0_11 = arith.constant 0 : index
    %6 = vector.load %arg10[%c0_9, %c0_10, %c0_11] : memref<1x1x32xf32, #tpu.memory_space<vmem>>, vector<1x1x32xf32>
    %cst = arith.constant dense<0.000000e+00> : vector<1x8xf32>
    %7 = vector.multi_reduction <add>, %4, %cst [2] : vector<1x8x32xf32> to vector<1x8xf32>
    %8 = vector.shape_cast %7 : vector<1x8xf32> to vector<1x8x1xf32>
    %cst_12 = arith.constant 3.200000e+01 : f32
    %9 = vector.broadcast %cst_12 : f32 to vector<1x8x1xf32>
    %10 = arith.divf %8, %9 : vector<1x8x1xf32>
    %11 = vector.broadcast %10 : vector<1x8x1xf32> to vector<1x8x32xf32>
    %12 = arith.subf %4, %11 : vector<1x8x32xf32>
    %13 = arith.mulf %12, %12 : vector<1x8x32xf32>
    %cst_13 = arith.constant dense<0.000000e+00> : vector<1x8xf32>
    %14 = vector.multi_reduction <add>, %13, %cst_13 [2] : vector<1x8x32xf32> to vector<1x8xf32>
    %15 = vector.shape_cast %14 : vector<1x8xf32> to vector<1x8x1xf32>
    %cst_14 = arith.constant 3.200000e+01 : f32
    %16 = vector.broadcast %cst_14 : f32 to vector<1x8x1xf32>
    %17 = arith.divf %15, %16 : vector<1x8x1xf32>
    %18 = vector.broadcast %10 : vector<1x8x1xf32> to vector<1x8x32xf32>
    %19 = arith.subf %4, %18 : vector<1x8x32xf32>
    %cst_15 = arith.constant 9.99999996E-13 : f32
    %20 = vector.broadcast %cst_15 : f32 to vector<1x8x1xf32>
    %21 = arith.addf %17, %20 : vector<1x8x1xf32>
    %22 = math.rsqrt %21 : vector<1x8x1xf32>
    %23 = vector.broadcast %22 : vector<1x8x1xf32> to vector<1x8x32xf32>
    %24 = arith.mulf %19, %23 : vector<1x8x32xf32>
    %25 = vector.broadcast %5 : vector<1x1x32xf32> to vector<1x8x32xf32>
    %26 = arith.mulf %24, %25 : vector<1x8x32xf32>
    %27 = vector.broadcast %6 : vector<1x1x32xf32> to vector<1x8x32xf32>
    %28 = arith.addf %26, %27 : vector<1x8x32xf32>
    %29 = vector.shape_cast %28 : vector<1x8x32xf32> to vector<8x32xf32>
    %c0_16 = arith.constant 0 : index
    %c0_17 = arith.constant 0 : index
    %c0_18 = arith.constant 0 : index
    %30 = vector.load %arg3[%c0_16, %c0_17, %c0_18] : memref<1x32x96xbf16, #tpu.memory_space<vmem>>, vector<1x32x96xbf16>
    %31 = vector.shape_cast %30 : vector<1x32x96xbf16> to vector<32x96xbf16>
    %32 = arith.truncf %29 : vector<8x32xf32> to vector<8x32xbf16>
    %cst_19 = arith.constant dense<0.000000e+00> : vector<8x96xf32>
    %33 = tpu.matmul %32, %31, %cst_19 {dimension_numbers = #tpu.dot_dimension_numbers<[1], [0], [0], [1], [0, 0, 1, 1], [], []>} : vector<8x32xbf16>, vector<32x96xbf16>, vector<8x96xf32> -> vector<8x96xf32>
    %34 = vector.extract_strided_slice %33 {offsets = [0, 0], sizes = [8, 32], strides = [1, 1]} : vector<8x96xf32> to vector<8x32xf32>
    %cst_20 = arith.constant 0.353553385 : f32
    %35 = vector.broadcast %cst_20 : f32 to vector<8x32xf32>
    %36 = arith.mulf %34, %35 : vector<8x32xf32>
    %37 = vector.shape_cast %36 : vector<8x32xf32> to vector<8x4x8xf32>
    %38 = vector.extract_strided_slice %33 {offsets = [0, 32], sizes = [8, 32], strides = [1, 1]} : vector<8x96xf32> to vector<8x32xf32>
    %39 = vector.shape_cast %38 : vector<8x32xf32> to vector<8x4x8xf32>
    %40 = vector.extract_strided_slice %33 {offsets = [0, 64], sizes = [8, 32], strides = [1, 1]} : vector<8x96xf32> to vector<8x32xf32>
    %41 = vector.shape_cast %40 : vector<8x32xf32> to vector<8x4x8xf32>
    %42 = tpu.transpose %37, [1, 0, 2] : vector<8x4x8xf32> -> vector<4x8x8xf32>
    %43 = tpu.transpose %39, [1, 0, 2] : vector<8x4x8xf32> -> vector<4x8x8xf32>
    %44 = tpu.transpose %41, [1, 0, 2] : vector<8x4x8xf32> -> vector<4x8x8xf32>
    %45 = arith.truncf %42 : vector<4x8x8xf32> to vector<4x8x8xbf16>
    %46 = arith.truncf %43 : vector<4x8x8xf32> to vector<4x8x8xbf16>
    "tpu.trace_start"() <{level = 10 : i32, message = "hqd,hkd->hqk"}> : () -> ()
    %cst_21 = arith.constant dense<0.000000e+00> : vector<4x8x8xf32>
    %47 = tpu.matmul %45, %46, %cst_21 {dimension_numbers = #tpu.dot_dimension_numbers<[2], [2], [1], [1], [0, 0, 0, 1, 1, 1], [0], [0]>} : vector<4x8x8xbf16>, vector<4x8x8xbf16>, vector<4x8x8xf32> -> vector<4x8x8xf32>
    "tpu.trace_stop"() : () -> ()
    %cst_22 = arith.constant dense<0xFF800000> : vector<4x8xf32>
    %48 = vector.multi_reduction <maximumf>, %47, %cst_22 [2] : vector<4x8x8xf32> to vector<4x8xf32>
    %49 = vector.shape_cast %48 : vector<4x8xf32> to vector<4x8x1xf32>
    %50 = vector.broadcast %49 : vector<4x8x1xf32> to vector<4x8x8xf32>
    %51 = arith.subf %47, %50 : vector<4x8x8xf32>
    %52 = math.exp %51 : vector<4x8x8xf32>
    %cst_23 = arith.constant dense<0.000000e+00> : vector<4x8xf32>
    %53 = vector.multi_reduction <add>, %52, %cst_23 [2] : vector<4x8x8xf32> to vector<4x8xf32>
    %54 = vector.shape_cast %53 : vector<4x8xf32> to vector<4x8x1xf32>
    %55 = vector.broadcast %54 : vector<4x8x1xf32> to vector<4x8x8xf32>
    %56 = arith.divf %52, %55 : vector<4x8x8xf32>
    %57 = arith.truncf %56 : vector<4x8x8xf32> to vector<4x8x8xbf16>
    %58 = arith.truncf %44 : vector<4x8x8xf32> to vector<4x8x8xbf16>
    "tpu.trace_start"() <{level = 10 : i32, message = "hqk,hkd->hqd"}> : () -> ()
    %cst_24 = arith.constant dense<0.000000e+00> : vector<4x8x8xf32>
    %59 = tpu.matmul %57, %58, %cst_24 {dimension_numbers = #tpu.dot_dimension_numbers<[2], [1], [1], [2], [0, 0, 0, 1, 1, 2], [0], [0]>} : vector<4x8x8xbf16>, vector<4x8x8xbf16>, vector<4x8x8xf32> -> vector<4x8x8xf32>
    "tpu.trace_stop"() : () -> ()
    %60 = tpu.transpose %59, [1, 0, 2] : vector<4x8x8xf32> -> vector<8x4x8xf32>
    %61 = vector.shape_cast %60 : vector<8x4x8xf32> to vector<8x32xf32>
    %c0_25 = arith.constant 0 : index
    %c0_26 = arith.constant 0 : index
    %c0_27 = arith.constant 0 : index
    %62 = vector.load %arg4[%c0_25, %c0_26, %c0_27] : memref<1x32x32xbf16, #tpu.memory_space<vmem>>, vector<1x32x32xbf16>
    %63 = vector.shape_cast %62 : vector<1x32x32xbf16> to vector<32x32xbf16>
    %64 = arith.truncf %61 : vector<8x32xf32> to vector<8x32xbf16>
    %cst_28 = arith.constant dense<0.000000e+00> : vector<8x32xf32>
    %65 = tpu.matmul %64, %63, %cst_28 {dimension_numbers = #tpu.dot_dimension_numbers<[1], [0], [0], [1], [0, 0, 1, 1], [], []>} : vector<8x32xbf16>, vector<32x32xbf16>, vector<8x32xf32> -> vector<8x32xf32>
    %66 = vector.shape_cast %65 : vector<8x32xf32> to vector<1x8x32xf32>
    %67 = arith.addf %3, %66 : vector<1x8x32xf32>
    %c0_29 = arith.constant 0 : index
    %c0_30 = arith.constant 0 : index
    %c0_31 = arith.constant 0 : index
    %68 = vector.load %arg11[%c0_29, %c0_30, %c0_31] : memref<1x1x32xf32, #tpu.memory_space<vmem>>, vector<1x1x32xf32>
    %c0_32 = arith.constant 0 : index
    %c0_33 = arith.constant 0 : index
    %c0_34 = arith.constant 0 : index
    %69 = vector.load %arg12[%c0_32, %c0_33, %c0_34] : memref<1x1x32xf32, #tpu.memory_space<vmem>>, vector<1x1x32xf32>
    %cst_35 = arith.constant dense<0.000000e+00> : vector<1x8xf32>
    %70 = vector.multi_reduction <add>, %67, %cst_35 [2] : vector<1x8x32xf32> to vector<1x8xf32>
    %71 = vector.shape_cast %70 : vector<1x8xf32> to vector<1x8x1xf32>
    %cst_36 = arith.constant 3.200000e+01 : f32
    %72 = vector.broadcast %cst_36 : f32 to vector<1x8x1xf32>
    %73 = arith.divf %71, %72 : vector<1x8x1xf32>
    %74 = vector.broadcast %73 : vector<1x8x1xf32> to vector<1x8x32xf32>
    %75 = arith.subf %67, %74 : vector<1x8x32xf32>
    %76 = arith.mulf %75, %75 : vector<1x8x32xf32>
    %cst_37 = arith.constant dense<0.000000e+00> : vector<1x8xf32>
    %77 = vector.multi_reduction <add>, %76, %cst_37 [2] : vector<1x8x32xf32> to vector<1x8xf32>
    %78 = vector.shape_cast %77 : vector<1x8xf32> to vector<1x8x1xf32>
    %cst_38 = arith.constant 3.200000e+01 : f32
    %79 = vector.broadcast %cst_38 : f32 to vector<1x8x1xf32>
    %80 = arith.divf %78, %79 : vector<1x8x1xf32>
    %81 = vector.broadcast %73 : vector<1x8x1xf32> to vector<1x8x32xf32>
    %82 = arith.subf %67, %81 : vector<1x8x32xf32>
    %cst_39 = arith.constant 9.99999996E-13 : f32
    %83 = vector.broadcast %cst_39 : f32 to vector<1x8x1xf32>
    %84 = arith.addf %80, %83 : vector<1x8x1xf32>
    %85 = math.rsqrt %84 : vector<1x8x1xf32>
    %86 = vector.broadcast %85 : vector<1x8x1xf32> to vector<1x8x32xf32>
    %87 = arith.mulf %82, %86 : vector<1x8x32xf32>
    %88 = vector.broadcast %68 : vector<1x1x32xf32> to vector<1x8x32xf32>
    %89 = arith.mulf %87, %88 : vector<1x8x32xf32>
    %90 = vector.broadcast %69 : vector<1x1x32xf32> to vector<1x8x32xf32>
    %91 = arith.addf %89, %90 : vector<1x8x32xf32>
    %92 = vector.shape_cast %91 : vector<1x8x32xf32> to vector<8x32xf32>
    %c0_40 = arith.constant 0 : index
    %c0_41 = arith.constant 0 : index
    %c0_42 = arith.constant 0 : index
    %93 = vector.load %arg5[%c0_40, %c0_41, %c0_42] : memref<1x32x64xbf16, #tpu.memory_space<vmem>>, vector<1x32x64xbf16>
    %94 = vector.shape_cast %93 : vector<1x32x64xbf16> to vector<32x64xbf16>
    %95 = arith.truncf %92 : vector<8x32xf32> to vector<8x32xbf16>
    %cst_43 = arith.constant dense<0.000000e+00> : vector<8x64xf32>
    %96 = tpu.matmul %95, %94, %cst_43 {dimension_numbers = #tpu.dot_dimension_numbers<[1], [0], [0], [1], [0, 0, 1, 1], [], []>} : vector<8x32xbf16>, vector<32x64xbf16>, vector<8x64xf32> -> vector<8x64xf32>
    %c0_44 = arith.constant 0 : index
    %c0_45 = arith.constant 0 : index
    %c0_46 = arith.constant 0 : index
    %97 = vector.load %arg6[%c0_44, %c0_45, %c0_46] : memref<1x1x64xf32, #tpu.memory_space<vmem>>, vector<1x1x64xf32>
    %98 = vector.shape_cast %97 : vector<1x1x64xf32> to vector<1x64xf32>
    %99 = vector.broadcast %98 : vector<1x64xf32> to vector<8x64xf32>
    %100 = arith.addf %96, %99 : vector<8x64xf32>
    %cst_47 = arith.constant 0.000000e+00 : f32
    %101 = vector.broadcast %cst_47 : f32 to vector<8x64xf32>
    %102 = arith.maximumf %100, %101 : vector<8x64xf32>
    %c0_48 = arith.constant 0 : index
    %c0_49 = arith.constant 0 : index
    %c0_50 = arith.constant 0 : index
    %103 = vector.load %arg7[%c0_48, %c0_49, %c0_50] : memref<1x64x32xbf16, #tpu.memory_space<vmem>>, vector<1x64x32xbf16>
    %104 = vector.shape_cast %103 : vector<1x64x32xbf16> to vector<64x32xbf16>
    %105 = arith.truncf %102 : vector<8x64xf32> to vector<8x64xbf16>
    %cst_51 = arith.constant dense<0.000000e+00> : vector<8x32xf32>
    %106 = tpu.matmul %105, %104, %cst_51 {dimension_numbers = #tpu.dot_dimension_numbers<[1], [0], [0], [1], [0, 0, 1, 1], [], []>} : vector<8x64xbf16>, vector<64x32xbf16>, vector<8x32xf32> -> vector<8x32xf32>
    %c0_52 = arith.constant 0 : index
    %c0_53 = arith.constant 0 : index
    %c0_54 = arith.constant 0 : index
    %107 = vector.load %arg8[%c0_52, %c0_53, %c0_54] : memref<1x1x32xf32, #tpu.memory_space<vmem>>, vector<1x1x32xf32>
    %108 = vector.shape_cast %107 : vector<1x1x32xf32> to vector<1x32xf32>
    %109 = vector.broadcast %108 : vector<1x32xf32> to vector<8x32xf32>
    %110 = arith.addf %106, %109 : vector<8x32xf32>
    %111 = vector.shape_cast %110 : vector<8x32xf32> to vector<1x8x32xf32>
    %112 = arith.addf %4, %111 : vector<1x8x32xf32>
    %c0_55 = arith.constant 0 : index
    %c0_56 = arith.constant 0 : index
    %c0_57 = arith.constant 0 : index
    %113 = vector.load %arg17[%c0_55, %c0_56, %c0_57] : memref<1x8x32xf32, #tpu.memory_space<vmem>>, vector<1x8x32xf32>
    tpu.vector_store %arg17[%c0_55, %c0_56, %c0_57], %67 {strides = array<i32>} : memref<1x8x32xf32, #tpu.memory_space<vmem>>, vector<1x8x32xf32>,
    %c0_58 = arith.constant 0 : index
    %c0_59 = arith.constant 0 : index
    %c0_60 = arith.constant 0 : index
    %114 = vector.load %arg18[%c0_58, %c0_59, %c0_60] : memref<1x8x32xf32, #tpu.memory_space<vmem>>, vector<1x8x32xf32>
    tpu.vector_store %arg18[%c0_58, %c0_59, %c0_60], %112 {strides = array<i32>} : memref<1x8x32xf32, #tpu.memory_space<vmem>>, vector<1x8x32xf32>,
    %c1_i32 = arith.constant 1 : i32
    %115 = arith.cmpi eq, %arg1, %c1_i32 : i32
    %116 = arith.extui %115 : i1 to i32
    %c0_i32_61 = arith.constant 0 : i32
    %117 = arith.cmpi ne, %116, %c0_i32_61 : i32
    scf.if %117 {
      %118 = tpu.concatenate %67, %112 in 2 : vector<1x8x32xf32>, vector<1x8x32xf32> -> vector<1x8x64xf32>
      %c0_62 = arith.constant 0 : index
      %c0_63 = arith.constant 0 : index
      %c0_64 = arith.constant 0 : index
      %119 = vector.load %arg13[%c0_62, %c0_63, %c0_64] : memref<1x1x64xf32, #tpu.memory_space<vmem>>, vector<1x1x64xf32>
      %c0_65 = arith.constant 0 : index
      %c0_66 = arith.constant 0 : index
      %c0_67 = arith.constant 0 : index
      %120 = vector.load %arg14[%c0_65, %c0_66, %c0_67] : memref<1x1x64xf32, #tpu.memory_space<vmem>>, vector<1x1x64xf32>
      %cst_68 = arith.constant dense<0.000000e+00> : vector<1x8xf32>
      %121 = vector.multi_reduction <add>, %118, %cst_68 [2] : vector<1x8x64xf32> to vector<1x8xf32>
      %122 = vector.shape_cast %121 : vector<1x8xf32> to vector<1x8x1xf32>
      %cst_69 = arith.constant 6.400000e+01 : f32
      %123 = vector.broadcast %cst_69 : f32 to vector<1x8x1xf32>
      %124 = arith.divf %122, %123 : vector<1x8x1xf32>
      %125 = vector.broadcast %124 : vector<1x8x1xf32> to vector<1x8x64xf32>
      %126 = arith.subf %118, %125 : vector<1x8x64xf32>
      %127 = arith.mulf %126, %126 : vector<1x8x64xf32>
      %cst_70 = arith.constant dense<0.000000e+00> : vector<1x8xf32>
      %128 = vector.multi_reduction <add>, %127, %cst_70 [2] : vector<1x8x64xf32> to vector<1x8xf32>
      %129 = vector.shape_cast %128 : vector<1x8xf32> to vector<1x8x1xf32>
      %cst_71 = arith.constant 6.400000e+01 : f32
      %130 = vector.broadcast %cst_71 : f32 to vector<1x8x1xf32>
      %131 = arith.divf %129, %130 : vector<1x8x1xf32>
      %132 = vector.broadcast %124 : vector<1x8x1xf32> to vector<1x8x64xf32>
      %133 = arith.subf %118, %132 : vector<1x8x64xf32>
      %cst_72 = arith.constant 9.99999996E-13 : f32
      %134 = vector.broadcast %cst_72 : f32 to vector<1x8x1xf32>
      %135 = arith.addf %131, %134 : vector<1x8x1xf32>
      %136 = math.rsqrt %135 : vector<1x8x1xf32>
      %137 = vector.broadcast %136 : vector<1x8x1xf32> to vector<1x8x64xf32>
      %138 = arith.mulf %133, %137 : vector<1x8x64xf32>
      %139 = vector.broadcast %119 : vector<1x1x64xf32> to vector<1x8x64xf32>
      %140 = arith.mulf %138, %139 : vector<1x8x64xf32>
      %141 = vector.broadcast %120 : vector<1x1x64xf32> to vector<1x8x64xf32>
      %142 = arith.addf %140, %141 : vector<1x8x64xf32>
      %c0_73 = arith.constant 0 : index
      %c0_74 = arith.constant 0 : index
      %c0_75 = arith.constant 0 : index
      %143 = vector.load %arg15[%c0_73, %c0_74, %c0_75] : memref<1x8x64xf32, #tpu.memory_space<vmem>>, vector<1x8x64xf32>
      %cst_76 = arith.constant 5.000000e-02 : f32
      %144 = vector.broadcast %cst_76 : f32 to vector<1x8x64xf32>
      %145 = arith.cmpf oge, %143, %144 : vector<1x8x64xf32>
      %cst_77 = arith.constant 1.05263162 : f32
      %146 = vector.broadcast %cst_77 : f32 to vector<1x8x64xf32>
      %147 = arith.mulf %142, %146 : vector<1x8x64xf32>
      %cst_78 = arith.constant 0.000000e+00 : f32
      %148 = vector.broadcast %cst_78 : f32 to vector<1x8x64xf32>
      %149 = arith.select %145, %147, %148 : vector<1x8x64xi1>, vector<1x8x64xf32>
      %c0_79 = arith.constant 0 : index
      %c0_80 = arith.constant 0 : index
      %c0_81 = arith.constant 0 : index
      %150 = vector.load %arg16[%c0_79, %c0_80, %c0_81] : memref<1x8x64xf32, #tpu.memory_space<vmem>>, vector<1x8x64xf32>
      tpu.vector_store %arg16[%c0_79, %c0_80, %c0_81], %149 {strides = array<i32>} : memref<1x8x64xf32, #tpu.memory_space<vmem>>, vector<1x8x64xf32>,
    } else {
    }
    return
  }
  func.func @transform_0(%arg0: i32, %arg1: i32) -> (i32, i32, i32) {
    %c0_i32 = arith.constant 0 : i32
    %c0_i32_0 = arith.constant 0 : i32
    %c0_i32_1 = arith.constant 0 : i32
    return %arg0, %c0_i32, %c0_i32_0 : i32, i32, i32
  }
  func.func @transform_1(%arg0: i32, %arg1: i32) -> (i32, i32, i32) {
    %c0_i32 = arith.constant 0 : i32
    %c0_i32_0 = arith.constant 0 : i32
    %c0_i32_1 = arith.constant 0 : i32
    return %arg1, %c0_i32, %c0_i32_0 : i32, i32, i32
  }
  func.func @transform_2(%arg0: i32, %arg1: i32) -> (i32, i32, i32) {
    %c0_i32 = arith.constant 0 : i32
    %c0_i32_0 = arith.constant 0 : i32
    %c0_i32_1 = arith.constant 0 : i32
    return %arg1, %c0_i32, %c0_i32_0 : i32, i32, i32
  }
  func.func @transform_3(%arg0: i32, %arg1: i32) -> (i32, i32, i32) {
    %c0_i32 = arith.constant 0 : i32
    %c0_i32_0 = arith.constant 0 : i32
    %c0_i32_1 = arith.constant 0 : i32
    return %arg1, %c0_i32, %c0_i32_0 : i32, i32, i32
  }
  func.func @transform_4(%arg0: i32, %arg1: i32) -> (i32, i32, i32) {
    %c0_i32 = arith.constant 0 : i32
    %c0_i32_0 = arith.constant 0 : i32
    %c0_i32_1 = arith.constant 0 : i32
    return %arg1, %c0_i32, %c0_i32_0 : i32, i32, i32
  }
  func.func @transform_5(%arg0: i32, %arg1: i32) -> (i32, i32, i32) {
    %c0_i32 = arith.constant 0 : i32
    %c0_i32_0 = arith.constant 0 : i32
    %c0_i32_1 = arith.constant 0 : i32
    return %arg1, %c0_i32, %c0_i32_0 : i32, i32, i32
  }
  func.func @transform_6(%arg0: i32, %arg1: i32) -> (i32, i32, i32) {
    %c0_i32 = arith.constant 0 : i32
    %c0_i32_0 = arith.constant 0 : i32
    %c0_i32_1 = arith.constant 0 : i32
    return %arg1, %c0_i32, %c0_i32_0 : i32, i32, i32
  }
  func.func @transform_7(%arg0: i32, %arg1: i32) -> (i32, i32, i32) {
    %c0_i32 = arith.constant 0 : i32
    %c0_i32_0 = arith.constant 0 : i32
    %c0_i32_1 = arith.constant 0 : i32
    return %arg1, %c0_i32, %c0_i32_0 : i32, i32, i32
  }
  func.func @transform_8(%arg0: i32, %arg1: i32) -> (i32, i32, i32) {
    %c0_i32 = arith.constant 0 : i32
    %c0_i32_0 = arith.constant 0 : i32
    %c0_i32_1 = arith.constant 0 : i32
    return %arg1, %c0_i32, %c0_i32_0 : i32, i32, i32
  }
  func.func @transform_9(%arg0: i32, %arg1: i32) -> (i32, i32, i32) {
    %c0_i32 = arith.constant 0 : i32
    %c0_i32_0 = arith.constant 0 : i32
    %c0_i32_1 = arith.constant 0 : i32
    return %arg1, %c0_i32, %c0_i32_0 : i32, i32, i32
  }
  func.func @transform_10(%arg0: i32, %arg1: i32) -> (i32, i32, i32) {
    %c0_i32 = arith.constant 0 : i32
    %c0_i32_0 = arith.constant 0 : i32
    %c0_i32_1 = arith.constant 0 : i32
    return %arg1, %c0_i32, %c0_i32_0 : i32, i32, i32
  }
  func.func @transform_11(%arg0: i32, %arg1: i32) -> (i32, i32, i32) {
    %c0_i32 = arith.constant 0 : i32
    %c0_i32_0 = arith.constant 0 : i32
    %c0_i32_1 = arith.constant 0 : i32
    %c0_i32_2 = arith.constant 0 : i32
    return %c0_i32, %c0_i32_0, %c0_i32_1 : i32, i32, i32
  }
  func.func @transform_12(%arg0: i32, %arg1: i32) -> (i32, i32, i32) {
    %c0_i32 = arith.constant 0 : i32
    %c0_i32_0 = arith.constant 0 : i32
    %c0_i32_1 = arith.constant 0 : i32
    %c0_i32_2 = arith.constant 0 : i32
    return %c0_i32, %c0_i32_0, %c0_i32_1 : i32, i32, i32
  }
  func.func @transform_13(%arg0: i32, %arg1: i32) -> (i32, i32, i32) {
    %c0_i32 = arith.constant 0 : i32
    %c0_i32_0 = arith.constant 0 : i32
    %c0_i32_1 = arith.constant 0 : i32
    return %arg0, %c0_i32, %c0_i32_0 : i32, i32, i32
  }
  func.func @transform_14(%arg0: i32, %arg1: i32) -> (i32, i32, i32) {
    %c0_i32 = arith.constant 0 : i32
    %c0_i32_0 = arith.constant 0 : i32
    %c0_i32_1 = arith.constant 0 : i32
    return %arg0, %c0_i32, %c0_i32_0 : i32, i32, i32
  }
}

</mosaic_0001>

<bundles_post_ra>
// kernel: tpu_custom_call.1
= control target key start
LH: loop header
LB: loop body
LE: loop exit
PB: predicated region body
PF: predicated region fallthrough
CT: control target
= control target key end

     0   :  { %s3329_s0 = inlined_call_operand.hbm [shape: f32[2,8,32], index: 0, kind: input, shape index: {}]   ;;  %s3330_s1 = inlined_call_operand.vmem [shape: bf16[2,32,96], index: 1, kind: input, shape index: {}]   ;;  %s3331_s2 = inlined_call_operand.vmem [shape: bf16[2,32,32], index: 2, kind: input, shape index: {}]   ;;  %s3332_s3 = inlined_call_operand.vmem [shape: bf16[2,32,64], index: 3, kind: input, shape index: {}]   ;;  %s3333_s4 = inlined_call_operand.vmem [shape: f32[2,1,64], index: 4, kind: input, shape index: {}]   ;;  %s3334_s5 = inlined_call_operand.vmem [shape: bf16[2,64,32], index: 5, kind: input, shape index: {}]   ;;  %s3335_s6 = inlined_call_operand.vmem [shape: f32[2,1,32], index: 6, kind: input, shape index: {}]   ;;  %s3336_s7 = inlined_call_operand.vmem [shape: f32[2,1,32], index: 7, kind: input, shape index: {}]   ;;  %s3337_s8 = inlined_call_operand.vmem [shape: f32[2,1,32], index: 8, kind: input, shape index: {}]   ;;  %s3338_s9 = inlined_call_operand.vmem [shape: f32[2,1,32], index: 9, kind: input, shape index: {}]   ;;  %s3339_s10 = inlined_call_operand.vmem [shape: f32[2,1,32], index: 10, kind: input, shape index: {}]   ;;  %s3340_s11 = inlined_call_operand.vmem [shape: f32[1,1,64], index: 11, kind: input, shape index: {}]   ;;  %s3341_s12 = inlined_call_operand.vmem [shape: f32[1,1,64], index: 12, kind: input, shape index: {}]   ;;  %s3342_s13 = inlined_call_operand.vmem [shape: f32[2,8,64], index: 13, kind: input, shape index: {}]   ;;  %s3343_s14 = inlined_call_operand.hbm [shape: f32[2,8,64], index: 14, kind: output, shape index: {}]  }
   0x1   :  { %3359 = sst [smem:[#allocation23_spill]] %s3329_s0 }
   0x2   :  { %3360 = sst [smem:[#allocation24_spill]] %s3330_s1 }
   0x3   :  { %3361 = sst [smem:[#allocation25_spill]] %s3331_s2 }
   0x4   :  { %3362 = sst [smem:[#allocation26_spill]] %s3332_s3 }
   0x5   :  { %3363 = sst [smem:[#allocation27_spill]] %s3333_s4 }
   0x6   :  { %3364 = sst [smem:[#allocation28_spill]] %s3334_s5 }
   0x7   :  { %3365 = sst [smem:[#allocation29_spill]] %s3340_s11 }
   0x8   :  { %3366 = sst [smem:[#allocation30_spill]] %s3341_s12 }
   0x9   :  { %3367 = sst [smem:[#allocation31_spill]] %s3342_s13 }
   0xa   :  { %3368 = sst [smem:[#allocation32_spill]] %s3343_s14 }
   0xb   :  { %19 = vsyncpa [#allocation5], 0 }
   0xc   :  { %21 = vsyncpa [#allocation5 + $0x1], 0 }
   0xd   :  { %22 = vsyncpa [#allocation6], 0 }
   0xe   :  { %24 = vsyncpa [#allocation6 + $0x1], 0  ;;  %s2832_s29 = smov 0   ;;  %s2834_s30 = smov 0  }
   0xf   :  { %s2836_s15 = smov 0   ;;  %s2838_s16 = smov 0  }
  0x10   :  { %s2840_s17 = smov 0   ;;  %s2842_s18 = smov 0  }
  0x11   :  { %s2844_s19 = smov 0   ;;  %s2846_s20 = smov 0  }
  0x12 LB: > { %3369 = sst [smem:[#allocation10_spill]] %s2712_s29  ;;  %s2309_s21 = sadd.s32 4294967295, %s2740_s20   ;;  %s2740_s20 = sphi %s2846_s20, %s30_s20   ;;  %s2736_s19 = sphi %s2844_s19, %s3417_s19   ;;  %s2732_s18 = sphi %s2842_s18, %s3416_s18   ;;  %s2728_s17 = sphi %s2840_s17, %s3415_s17   ;;  %s2724_s16 = sphi %s2838_s16, %s3414_s16   ;;  %s2720_s15 = sphi %s2836_s15, %s3413_s15   ;;  %s2716_s30 = sphi %s2834_s30, %s3412_s30   ;;  %s2712_s29 = sphi %s2832_s29, %s3411_s29  }
  0x13   : > { %3370 = sst [smem:[#allocation11_spill]] %s2716_s30  ;;  %s2310_s22 = sadd.s32 4294967294, %s2740_s20  }
  0x14   : > { %3371 = sst [smem:[#allocation12_spill]] %s2720_s15  ;;  %s39_s23 = sadd.s32 1, %s2732_s18 }
  0x15   : > { %3372 = sst [smem:[#allocation13_spill]] %s2728_s17  ;;  %s42_s24 = sadd.s32 1, %s2736_s19 }
  0x16   : > { %3373 = sst [smem:[#allocation14_spill]] %s2732_s18  ;;  %p40_p0 = scmp.ge.s32.totalorder %s39_s23, 2 }
  0x17   : > { %3374 = sst [smem:[#allocation15_spill]] %s2736_s19  ;;  %s49_s25 = sadd.s32 1, %s2720_s15 }
  0x18   : > { %3375 = sst [smem:[#allocation16_spill]] %s2740_s20  ;;  %p56_p1 = scmp.ne.s32.totalorder %s2720_s15, %s2716_s30 }
  0x19   : > { %p57_p2 = scmp.eq.s32.totalorder %s2740_s20, 0  ;;  %s3419_s23 = smov (%p40_p0, %s39_s23), 0 }
  0x1a   : > { %3376 = sst [smem:[#allocation17_spill]] %s3419_s23  ;;  %s3421_s24 = smov (!%p40_p0, %s42_s24), %s2736_s19 }
  0x1b   : > { %p2883_p3 = por %p57_p2, %p56_p1  ;;  %p62_p4 = scmp.ne.s32.totalorder %s2716_s30, %s2712_s29 }
  0x1c   : > { %p44_p5 = scmp.ge.s32.totalorder %s3421_s24, 2  ;;  %p63_p6 = scmp.eq.s32.totalorder %s2309_s21, 0 }
  0x1d   : > { %p414_p7 = scmp.eq.s32.totalorder %s2309_s21, 3  ;;  %p420_p8 = scmp.eq.s32.totalorder %s2310_s22, 3 }
  0x1e   : > { %s3423_s24 = smov (%p44_p5, %s3421_s24), 0  ;;  %p2891_p9 = por %p63_p6, %p62_p4 }
  0x1f   : > { %3378 = sst [smem:[#allocation18_spill]] %s3423_s24  ;;  %p2895_p10 = por %p414_p7, %p56_p1 }
  0x20   : > { %s46_s23 = ssub.s32 %s2736_s19, %s3423_s24  ;;  %p2901_p11 = por %p420_p8, %p62_p4 }
  0x21   : > { %s3380_s28 = scalar_select %p2895_p10, 1, 0 }
  0x22   : > { %s3382_s18 = scalar_select %p2901_p11, 1, 0 }
  0x23   : > { %3381 = sst [smem:[#allocation19_spill]] %s3380_s28  ;;  %p47_p12 = scmp.eq.s32.totalorder %s46_s23, 0 }
  0x24   : > { %3383 = sst [smem:[#allocation20_spill]] %s3382_s18  ;;  %p2501_p13 = scmp.lt.s32.totalorder %s2740_s20, 4 }
  0x25   : > { %s446_s21 = sand.u32 1, %s2720_s15   ;;  %s2314_s14 = sshll.u32 %s2736_s19, 7 }
  0x26   : > { %s2908_s22 = scalar_select %p47_p12, %s2720_s15, %s49_s25  }
  0x27   : > { %s2313_s29 = sshll.u32 %s446_s21, 3  ;;  %s3385_s0 = sld [smem:[#allocation23_spill]] }
  0x28   : > { %3384 = sst [smem:[#allocation21_spill]] %s2908_s22  ;;  %s450_s24 = scalar_lea.vmem [#allocation4], %s2313_s29 }
  0x29   : > { %s457_s28 = sshll.u32 %s450_s24, 4  ;;  %p2920_p0 = pnand %p2501_p13, %p2883_p3  ;;  %s2916_s28 = int_to_ptr.vmem [resolvable:$true] %s457_s28 }
  0x2a   : > { %s447_s11 = scalar_lea.sflag [#allocation5], %s446_s21 }
  0x2b   : > { %p2614_p5 = pneg %p2920_p0 }
  0x2d   : > { %s2914_s13 = scalar_lea.hbm %s3385_s0, %s2314_s14  ;;  %s2617_s24 = scalar_lea.hbm %s3385_s0, 256 }
  0x2e   : > { %s2612_s12 = scalar_lea.hbm %s2914_s13, 128  ;;  %p2618_p3 = scmp.lt.u32.totalorder %s2914_s13, %s3385_s0 }
  0x2f   : > { %p2613_p4 = scmp.ne.s32.totalorder %s2914_s13, %s2612_s12  ;;  %p2619_p8 = scmp.lt.u32.totalorder %s2617_s24, %s2612_s12 }
  0x30   : > { %p2621_p13 = scmp.lt.u32.totalorder %s2612_s12, %s2914_s13 }
  0x31   : > { %p2615_p6 = pnand %p2614_p5, %p2613_p4  ;;  %p2620_p12 = por %p2619_p8, %p2618_p3 }
  0x33   : > { %p2616_p7 = pneg %p2615_p6  ;;  %p2622_p1 = por %p2621_p13, %p2620_p12 }
  0x35   : > { %p2623_p2 = pnand %p2622_p1, %p2616_p7 }
  0x37   : > { %2626 = shalt.err (!%p2623_p2)
}
  0x38   : > { %s2627_s21 = scalar_lea.vmem %s2916_s28, 128  ;;  %s2742_s14 = smov [#allocation4]  }
  0x39   : > { %p2628_p4 = scmp.ne.s32.totalorder %s2916_s28, %s2627_s21  ;;  %s2632_s29 = sshll.u32 %s2742_s14, 4  ;;  %s2633_s29 = int_to_ptr.vmem [resolvable:$false] %s2632_s29 }
  0x3a   : > { %s2634_s25 = scalar_lea.vmem %s2633_s29, 256  ;;  %p2635_p10 = scmp.lt.s32.totalorder %s2916_s28, %s2633_s29 }
  0x3b   : > { %p2630_p6 = pnand %p2628_p4, %p2614_p5  ;;  %p2636_p3 = scmp.lt.s32.totalorder %s2634_s25, %s2627_s21 }
  0x3d   : > { %p2631_p11 = pneg %p2630_p6  ;;  %p2637_p8 = por %p2636_p3, %p2635_p10 }
  0x3f   : > { %p2638_p12 = pnand %p2637_p8, %p2631_p11 }
  0x41   : > { %2641 = shalt.err (!%p2638_p12)
}
  0x42   : > { %2496 = dma.hbm_to_vmem [thread:$0]  (!%p2920_p0), %s2914_s13, 128, %s2916_s28, %s447_s11  }
  0x43   : > { %p3387_p1 = scmp.lt.s32.totalorder %s2740_s20, 5  ;;  %p3388_p2 = scmp.ge.s32.totalorder %s2740_s20, 1 }
  0x45   : > { %p538_p5 = pnand %p3388_p2, %p3387_p1 }
  0x47   : > { %541 = sbr.rel (%p538_p5) target bundleno = 3255 (0xcb7), region = 76 }
  0x4e   : > { %s2956_s12 = sand.u32 1, %s2716_s30  }
  0x4f   : > { %3389 = sst [smem:[#allocation22_spill]] %s2956_s12  ;;  %s2316_s24 = sshll.u32 %s2956_s12, 3 }
  0x50   : > { %s544_s26 = scalar_lea.sflag [#allocation5], %s2956_s12  ;;  %s547_s21 = scalar_lea.vmem [#allocation4], %s2316_s24 }
  0x51   : > { %2703 = dma.done.wait (%p2891_p9), %s544_s26, 128  }
  0x52   : > { %2705 = vsyncadd (%p2891_p9), %s544_s26, 4294967168  ;;  %p634_p10 = scmp.lt.s32.totalorder %s2724_s16, 1  ;;  %p672_p11 = scmp.lt.s32.totalorder %s2728_s17, 1 }
  0x53   : > { %s3391_s1 = sld [smem:[#allocation24_spill]]  ;;  %s3392_s2 = sld [smem:[#allocation25_spill]] }
  0x54   : > { %s2967_s13 = scalar_select %p634_p10, %s2724_s16, 1 }
  0x55   : > { %s673_s28 = scalar_select %p672_p11, %s2728_s17, 1 }
  0x56   : > { %s2371_s23 = sshll.u32 %s2967_s13, 4  ;;  %s3393_s3 = sld [smem:[#allocation26_spill]] }
  0x57   : > { %s2374_s20 = sshll.u32 %s2967_s13, 5  ;;  %s3394_s5 = sld [smem:[#allocation28_spill]] }
  0x58   : > { %s662_s0 = scalar_lea.vmem %s3336_s7, %s2967_s13  ;;  %s665_s30 = scalar_lea.vmem %s3337_s8, %s2967_s13 }
  0x59   : > { %s2978_s26 = scalar_lea.vmem %s3391_s1, %s2371_s23  ;;  %s2983_s22 = scalar_lea.vmem %s3392_s2, %s2371_s23 }
  0x5a   : > { %s2326_s12 = sshll.u32 %s673_s28, 3  ;;  %s3395_s29 = sld [smem:[#allocation31_spill]] }
  0x5b   : > { %s3021_s1 = scalar_lea.vmem [#allocation7], %s2316_s24  ;;  %p2327_p9 = scmp.ne.s32.totalorder %s2724_s16, 0 }
  0x5c   : > { %s2988_s18 = scalar_lea.vmem %s3393_s3, %s2371_s23  ;;  %s668_s3 = scalar_lea.vmem %s3338_s9, %s2967_s13  ;;  %v681_v0 = vld [vmem:[%s547_s21] sm:$0xff] (!%p2327_p9)  ;;  %vm682_vm0 = vcmask (!%p2327_p9), 261120  }
  0x5d   : > { %s2994_s27 = scalar_lea.vmem %s3394_s5, %s2374_s20  ;;  %s671_s20 = scalar_lea.vmem %s3339_s10, %s2967_s13  ;;  %683 = vst.msk [vmem:[#allocation2] sm:$0xff] (!%p2327_p9), %vm682_vm0, %v681_v0  ;;  %684 = vst.msk [vmem:[#allocation3] sm:$0xff] (!%p2327_p9), %vm682_vm0, %v681_v0 }
  0x5e   : > { %680 = sbr.rel (%p2327_p9) target bundleno = 101 (0x65), region = 84 }
  0x60   : > { %s3019_s25 = scalar_lea.vmem %s3395_s29, %s2326_s12 }
  0x65 PF: > { %v3024_v1 = vld [vmem:[#allocation3] sm:$0xff]  ;;  %vm689_vm1 = vcmask 261120   ;;  %v2580_v8 = vld [vmem:[%s2978_s26] sm:$0xff]   ;;  %v2743_v9 = vmov 0.0   ;;  %vm2744_vm2 = vmmov 0   ;;  %s2745_s21 = smov 104   ;;  %v794_v32 = vlaneseq }
  0x66   : > { %v690_v2 = vsel %vm689_vm1, %v3024_v1, 0.0  ;;  %2405 = vmatprep.subr.bf16.mxu0 %v2743_v9  ;;  %2409 = vmatprep.mubr.msk.bf16.mxu0 %vm2744_vm2, %v2743_v9  ;;  %v2581_v10 = vld [vmem:[%s2978_s26 + $0x8] sm:$0xff]   ;;  %v2328_v15 = vld [vmem:[%s662_s0] ss:$0 sm:$0xff]  ;;  %s2746_s28 = smov 120   ;;  %s2747_s14 = smov 112  }
  0x67   : > { %691 = vadd.xlane.f32.xlu0 %v690_v2  ;;  %2406 = vmatpush3.bf16.msra.mxu0 %v2580_v8  ;;  %v2329_v17 = vld [vmem:[%s665_s30] ss:$0 sm:$0xff]  ;;  %s2748_s26 = smov 96   ;;  %v2749_v30 = vmov 1983009808   ;;  %v795_v37 = vshrl.u32 %v794_v32, 7 }
  0x68   : > { %2413 = vmatprep.subr.bf16.mxu1 %v2743_v9  ;;  %2407 = vmatprep.subr.bf16.mxu0 %v2743_v9  ;;  %v792_v31 = vunpack.c.l.s4 %v2749_v30  ;;  %v2750_v34 = vmov 1934713408   ;;  %vm1236_vm3 = vcmask 64512   ;;  %s2751_s0 = smov 64   ;;  %vm1476_vm4 = vcmask 1043456   ;;  %s2753_s19 = smov 8  }
  0x69   : > { %2415 = vmatprep.mubr.msk.bf16.mxu1 %vm2744_vm2, %v2743_v9  ;;  %v824_v35 = vunpack.c.l.s4 %v2750_v34  ;;  %s2754_s30 = smov 24   ;;  %vm1807_vm5 = vcmask 130048   ;;  %vm1809_vm6 = vcmask 195584   ;;  %s3396_s11 = sld [smem:[#allocation27_spill]]  ;;  %vm2009_vm7 = vcmask 523264  }
  0x6a   : > { %v793_v36 = vunpack.c.0.s8 %v792_v31  ;;  %p2364_p0 = scmp.ne.s32.totalorder %s2724_s16, 1 }
  0x6b   : > { %2408 = vmatpush3.bf16.msra.mxu0 %v2581_v10  ;;  %v825_v39 = vunpack.c.0.s8 %v824_v35  ;;  %s2755_s4 = smov (!%p2364_p0), 32   ;;  %s3399_s5 = sld [smem:[#allocation29_spill]] (!%p2364_p0) }
  0x6c   : > { %2419 = vmatprep.subr.bf16.mxu0 %v2743_v9  ;;  %v3074_v40 = vsub.s32 %v793_v36, %v795_v37 }
  0x6d   : > { %v3076_v46 = vsub.s32 %v825_v39, %v795_v37 }
  0x6f   : > { %s3397_s29 = scalar_lea.vmem %s3396_s11, %s2967_s13 }
  0xf4   : > { %v692_v3 = vpop.xlane.xlu0 %691 }
  0xf5   : > { %v694_v4 = vmul.f32 0.03125, %v692_v3 }
  0xf7   : > { %v695_v5 = vsub.f32 %v3024_v1, %v694_v4 }
  0xf9   : > { %v696_v6 = vmul.f32 %v695_v5, %v695_v5 }
  0xfb   : > { %v697_v7 = vsel %vm689_vm1, %v696_v6, 0.0 }
  0xfc   : > { %698 = vadd.xlane.f32.xlu0 %v697_v7 }
 0x189   : > { %v699_v11 = vpop.xlane.xlu0 %698 }
 0x18a   : > { %v700_v12 = vmul.f32 0.03125, %v699_v11 }
 0x18c   : > { %v701_v13 = vadd.f32 1e-12, %v700_v12 }
 0x18e   : > { %2590 = vrsqrt.f32 %v701_v13 }
 0x198   : > { %v2591_v14 = vpop.eup %2590 }
 0x199   : > { %v703_v16 = vmul.f32 %v2591_v14, %v695_v5 }
 0x19b   : > { %v710_v18 = vmul.f32 %v2328_v15, %v703_v16 }
 0x19d   : > { %v717_v19 = vadd.f32 %v2329_v17, %v710_v18 }
 0x19f   : > { %v722_v20 = vpack.c.bf16 %v717_v19, %v717_v19 }
 0x1a1   : > { %2410 = vmatmul.mubr.msk.bf16.vlgmr.msra.gmra.mrb[0].mxu0 %vm689_vm1, %v722_v20 }
 0x1a2   : > { %2421 = vmatprep.mubr.msk.bf16.mxu0 %vm2744_vm2, %v2743_v9 }
 0x274   : > { %v3053_v21 = vpop.f32.mrb[0].mxu0 }
 0x275   : > { %862 = vrot.lane.b32.xlu0 %v3053_v21, %s2745_s21  ;;  %858 = vrot.lane.b32.xlu1 %v3053_v21, %s2746_s28  ;;  %v2411_v22 = vpop.f32.mrb[1].mxu0  ;;  %v3058_v24 = vmul.f32 0.35355338, %v3053_v21 }
 0x276   : > { %v775_v23 = vpop.f32.mrb[2].mxu0 }
 0x277   : > { %v2412_v25 = vpop.f32.mrb[3].mxu0 }
 0x279   : > { %860 = vrot.lane.b32.xlu1 %v3053_v21, %s2747_s14  ;;  %786 = vrot.lane.b32.xlu0 %v3058_v24, %s2745_s21 }
 0x27d   : > { %864 = vrot.lane.b32.xlu1 %v3053_v21, %s2748_s26 }
 0x2e7   : > { %v3063_v26 = vpop.permute.xlu1 %858  ;;  %v3069_v28 = vpop.permute.xlu0 %862 }
 0x2e8   : > { %866 = vrot.lane.b32.xlu1 %v3063_v26, %s2748_s26 }
 0x2eb   : > { %v3066_v27 = vpop.permute.xlu1 %860  ;;  %v787_v56 = vpop.permute.xlu0 %786 }
 0x2ec   : > { %868 = vrot.lane.b32.xlu1 %v3066_v27, %s2748_s26 }
 0x2ef   : > { %v865_v29 = vpop.permute.xlu1 %864 }
 0x2f0   : > { %870 = vrot.lane.b32.xlu1 %v3069_v28, %s2748_s26 }
 0x2f4   : > { %780 = vrot.lane.b32.xlu1 %v3058_v24, %s2746_s28  ;;  %s3400_s28 = sld [smem:[#allocation30_spill]] (!%p2364_p0) }
 0x2f8   : > { %783 = vrot.lane.b32.xlu1 %v3058_v24, %s2747_s14 }
 0x35a   : > { %v867_v33 = vpop.permute.xlu1 %866 }
 0x35e   : > { %v869_v38 = vpop.permute.xlu1 %868 }
 0x35f   : > { %v876_v41 = vcombine.low %v865_v29, %v869_v38  ;;  %v877_v42 = vcombine.high %v865_v29, %v869_v38 }
 0x361   : > { %v884_v47 = vrot.slane %v876_v41, %v3074_v40  ;;  %v891_v48 = vrot.slane %v877_v42, %v3074_v40 }
 0x362   : > { %v871_v43 = vpop.permute.xlu1 %870 }
 0x363   : > { %v892_v44 = vcombine.low %v867_v33, %v871_v43  ;;  %v893_v45 = vcombine.high %v867_v33, %v871_v43 }
 0x365   : > { %v900_v49 = vrot.slane %v892_v44, %v3074_v40  ;;  %v907_v50 = vrot.slane %v893_v45, %v3074_v40 }
 0x366   : > { %v781_v51 = vpop.permute.xlu1 %780 }
 0x367   : > { %v908_v52 = vcombine.low %v884_v47, %v900_v49  ;;  %v909_v53 = vcombine.high %v884_v47, %v900_v49  ;;  %v924_v54 = vcombine.low %v891_v48, %v907_v50  ;;  %v925_v55 = vcombine.high %v891_v48, %v907_v50 }
 0x368   : > { %v805_v61 = vcombine.low %v781_v51, %v787_v56  ;;  %v806_v62 = vcombine.high %v781_v51, %v787_v56 }
 0x369   : > { %v916_v57 = vrot.slane %v908_v52, %v3076_v46  ;;  %v923_v58 = vrot.slane %v909_v53, %v3076_v46  ;;  %v932_v59 = vrot.slane %v924_v54, %v3076_v46  ;;  %v939_v60 = vrot.slane %v925_v55, %v3076_v46 }
 0x36a   : > { %v784_v63 = vpop.permute.xlu1 %783  ;;  %v813_v12 = vrot.slane %v805_v61, %v3074_v40  ;;  %v820_v13 = vrot.slane %v806_v62, %v3074_v40 }
 0x36b   : > { %v1092_v0 = vcombine.low %v916_v57, %v923_v58  ;;  %v2335_v2 = vcombine.high %v916_v57, %v923_v58  ;;  %v1108_v3 = vcombine.low %v932_v59, %v939_v60  ;;  %v2336_v4 = vcombine.high %v932_v59, %v939_v60 }
 0x36c   : > { %v789_v5 = vcombine.low %v3058_v24, %v784_v63  ;;  %v790_v6 = vcombine.high %v3058_v24, %v784_v63 }
 0x36d   : > { %v1099_v7 = vrot.slane %v1092_v0, %v3074_v40  ;;  %v1107_v8 = vrot.slane %v2335_v2, %v3074_v40  ;;  %v1115_v10 = vrot.slane %v1108_v3, %v3074_v40  ;;  %v1123_v11 = vrot.slane %v2336_v4, %v3074_v40 }
 0x36e   : > { %v797_v14 = vrot.slane %v789_v5, %v3074_v40  ;;  %v804_v15 = vrot.slane %v790_v6, %v3074_v40 }
 0x36f   : > { %v1124_v16 = vcombine.low %v1099_v7, %v1107_v8  ;;  %v1140_v17 = vcombine.low %v1115_v10, %v1123_v11  ;;  %v1125_v25 = vcombine.high %v1099_v7, %v1107_v8  ;;  %v1141_v29 = vcombine.high %v1115_v10, %v1123_v11 }
 0x370   : > { %v821_v18 = vcombine.low %v797_v14, %v813_v12  ;;  %v822_v19 = vcombine.high %v797_v14, %v813_v12  ;;  %v837_v20 = vcombine.low %v804_v15, %v820_v13  ;;  %v838_v22 = vcombine.high %v804_v15, %v820_v13 }
 0x371   : > { %v1132_v23 = vrot.slane %v1124_v16, %v3076_v46  ;;  %v1148_v24 = vrot.slane %v1140_v17, %v3076_v46  ;;  %v1139_v43 = vrot.slane %v1125_v25, %v3076_v46  ;;  %v1155_v44 = vrot.slane %v1141_v29, %v3076_v46 }
 0x372   : > { %v829_v30 = vrot.slane %v821_v18, %v3076_v46  ;;  %v836_v31 = vrot.slane %v822_v19, %v3076_v46  ;;  %v845_v32 = vrot.slane %v837_v20, %v3076_v46  ;;  %v852_v33 = vrot.slane %v838_v22, %v3076_v46 }
 0x373   : > { %v1156_v34 = vcombine.low %v1132_v23, %v1148_v24  ;;  %v1157_v35 = vcombine.high %v1132_v23, %v1148_v24  ;;  %v1158_v54 = vcombine.low %v1139_v43, %v1155_v44  ;;  %v1159_v55 = vcombine.high %v1139_v43, %v1155_v44 }
 0x374   : > { %v1024_v36 = vcombine.low %v829_v30, %v836_v31  ;;  %v2333_v37 = vcombine.high %v829_v30, %v836_v31  ;;  %v1040_v38 = vcombine.low %v845_v32, %v852_v33  ;;  %v2334_v39 = vcombine.high %v845_v32, %v852_v33 }
 0x375   : > { %v1232_v41 = vpack.c.bf16 %v1156_v34, %v1156_v34  ;;  %v1233_v42 = vpack.c.bf16 %v1157_v35, %v1157_v35  ;;  %v1234_v62 = vpack.c.bf16 %v1158_v54, %v1158_v54  ;;  %v1235_v63 = vpack.c.bf16 %v1159_v55, %v1159_v55 }
 0x376   : > { %v1031_v45 = vrot.slane %v1024_v36, %v3074_v40  ;;  %v1039_v47 = vrot.slane %v2333_v37, %v3074_v40  ;;  %v1047_v48 = vrot.slane %v1040_v38, %v3074_v40  ;;  %v1055_v49 = vrot.slane %v2334_v39, %v3074_v40 }
 0x377   : > { %v1241_v50 = vsel %vm1236_vm3, %v1232_v41, 0  ;;  %v1287_v51 = vsel %vm1236_vm3, %v1233_v42, 0  ;;  %v1333_v5 = vsel %vm1236_vm3, %v1234_v62, 0  ;;  %v1379_v6 = vsel %vm1236_vm3, %v1235_v63, 0 }
 0x378   : > { %2414 = vmatpush3.bf16.xpose.msra.mxu1 %v1241_v50  ;;  %2420 = vmatpush3.bf16.xpose.msra.mxu0 %v1287_v51  ;;  %v1056_v52 = vcombine.low %v1031_v45, %v1039_v47  ;;  %v1072_v53 = vcombine.low %v1047_v48, %v1055_v49  ;;  %v1057_v57 = vcombine.high %v1031_v45, %v1039_v47 }
 0x379   : > { %2425 = vmatprep.subr.bf16.mxu1 %v2743_v9  ;;  %2431 = vmatprep.subr.bf16.mxu0 %v2743_v9  ;;  %v1073_v58 = vcombine.high %v1047_v48, %v1055_v49 }
 0x37a   : > { %v1064_v56 = vrot.slane %v1056_v52, %v3076_v46  ;;  %v1080_v59 = vrot.slane %v1072_v53, %v3076_v46  ;;  %v1071_v3 = vrot.slane %v1057_v57, %v3076_v46 }
 0x37b   : > { %v1087_v4 = vrot.slane %v1073_v58, %v3076_v46 }
 0x37c   : > { %v1088_v60 = vcombine.low %v1064_v56, %v1080_v59  ;;  %v1089_v61 = vcombine.high %v1064_v56, %v1080_v59 }
 0x37d   : > { %v1090_v7 = vcombine.low %v1071_v3, %v1087_v4  ;;  %v1091_v8 = vcombine.high %v1071_v3, %v1087_v4 }
 0x37e   : > { %v1228_v0 = vpack.c.bf16 %v1088_v60, %v1088_v60  ;;  %v1229_v2 = vpack.c.bf16 %v1089_v61, %v1089_v61 }
 0x37f   : > { %v1230_v10 = vpack.c.bf16 %v1090_v7, %v1090_v7  ;;  %v1231_v11 = vpack.c.bf16 %v1091_v8, %v1091_v8 }
 0x380   : > { %2416 = vmatmul.mubr.msk.bf16.vlgmr.msra.gmra.mrb[0].mxu1 %vm1236_vm3, %v1228_v0  ;;  %2422 = vmatmul.mubr.msk.bf16.vlgmr.msra.gmra.mrb[4].mxu0 %vm1236_vm3, %v1229_v2 }
 0x381   : > { %2426 = vmatpush3.bf16.xpose.msra.mxu1 %v1333_v5  ;;  %2432 = vmatpush3.bf16.xpose.msra.mxu0 %v1379_v6 }
 0x382   : > { %2427 = vmatprep.mubr.msk.bf16.mxu1 %vm2744_vm2, %v2743_v9  ;;  %2433 = vmatprep.mubr.msk.bf16.mxu0 %vm2744_vm2, %v2743_v9 }
 0x383   : > { %2437 = vmatprep.subr.bf16.mxu1 %v2743_v9  ;;  %2443 = vmatprep.subr.bf16.mxu0 %v2743_v9 }
 0x388   : > { %2428 = vmatmul.mubr.msk.bf16.vlgmr.msra.gmra.mrb[4].mxu1 %vm1236_vm3, %v1230_v10  ;;  %2434 = vmatmul.mubr.msk.bf16.vlgmr.msra.gmra.mrb[8].mxu0 %vm1236_vm3, %v1231_v11 }
 0x389   : > { %2439 = vmatprep.mubr.msk.bf16.mxu1 %vm2744_vm2, %v2743_v9  ;;  %2445 = vmatprep.mubr.msk.bf16.mxu0 %vm2744_vm2, %v2743_v9 }
 0x453   : > { %v1277_v12 = vpop.f32.mrb[0].mxu1  ;;  %v1323_v13 = vpop.f32.mrb[4].mxu0 }
 0x454   : > { %v2417_v14 = vpop.f32.mrb[1].mxu1  ;;  %v2423_v15 = vpop.f32.mrb[5].mxu0  ;;  %v1421_v16 = vsel %vm1236_vm3, %v1277_v12, -inf  ;;  %v1424_v17 = vsel %vm1236_vm3, %v1323_v13, -inf }
 0x455   : > { %1422 = vmax.xlane.f32.xlu1 %v1421_v16  ;;  %v1280_v18 = vpop.f32.mrb[2].mxu1  ;;  %1425 = vmax.xlane.f32.xlu0 %v1424_v17  ;;  %v1326_v19 = vpop.f32.mrb[6].mxu0 }
 0x456   : > { %v2418_v20 = vpop.f32.mrb[3].mxu1  ;;  %v2424_v22 = vpop.f32.mrb[7].mxu0 }
 0x45b   : > { %v1369_v23 = vpop.f32.mrb[4].mxu1  ;;  %v1415_v24 = vpop.f32.mrb[8].mxu0 }
 0x45c   : > { %v2429_v25 = vpop.f32.mrb[5].mxu1  ;;  %v2435_v29 = vpop.f32.mrb[9].mxu0  ;;  %v1427_v30 = vsel %vm1236_vm3, %v1369_v23, -inf  ;;  %v1430_v31 = vsel %vm1236_vm3, %v1415_v24, -inf }
 0x45d   : > { %v1372_v32 = vpop.f32.mrb[6].mxu1  ;;  %1428 = vmax.xlane.f32.xlu0 %v1427_v30  ;;  %1431 = vmax.xlane.f32.xlu1 %v1430_v31  ;;  %v1418_v33 = vpop.f32.mrb[10].mxu0 }
 0x45e   : > { %v2430_v34 = vpop.f32.mrb[7].mxu1  ;;  %v2436_v35 = vpop.f32.mrb[11].mxu0 }
 0x46e   : > { %946 = vrot.lane.b32.xlu1 %v3063_v26, %s2751_s0 }
 0x473   : > { %944 = vrot.lane.b32.xlu0 %v3053_v21, %s2751_s0 }
 0x4e2   : > { %v1423_v36 = vpop.xlane.xlu1 %1422  ;;  %v1426_v37 = vpop.xlane.xlu0 %1425 }
 0x4e3   : > { %v1433_v38 = vsub.f32 %v1277_v12, %v1423_v36  ;;  %v1434_v39 = vsub.f32 %v1323_v13, %v1426_v37 }
 0x4e5   : > { %v1437_v41 = vmul.f32 1.442695, %v1433_v38  ;;  %v1439_v42 = vmul.f32 1.442695, %v1434_v39 }
 0x4e7   : > { %2592 = vpow2.f32 %v1437_v41 }
 0x4e8   : > { %2594 = vpow2.f32 %v1439_v42 }
 0x4ea   : > { %v1432_v21 = vpop.xlane.xlu1 %1431  ;;  %v1429_v47 = vpop.xlane.xlu0 %1428 }
 0x4eb   : > { %v1436_v48 = vsub.f32 %v1415_v24, %v1432_v21  ;;  %v1435_v49 = vsub.f32 %v1369_v23, %v1429_v47 }
 0x4ed   : > { %v1443_v50 = vmul.f32 1.442695, %v1436_v48  ;;  %v1441_v51 = vmul.f32 1.442695, %v1435_v49 }
 0x4ee   : > { %v947_v55 = vpop.permute.xlu1 %946 }
 0x4ef   : > { %2596 = vpow2.f32 %v1443_v50 }
 0x4f0   : > { %2598 = vpow2.f32 %v1441_v51 }
 0x4f1   : > { %v3138_v43 = vpop.eup %2592 }
 0x4f2   : > { %v3140_v44 = vpop.eup %2594  ;;  %v1445_v45 = vsel %vm1236_vm3, %v3138_v43, 0.0 }
 0x4f3   : > { %1446 = vadd.xlane.f32.xlu0 %v1445_v45  ;;  %v1448_v26 = vsel %vm1236_vm3, %v3140_v44, 0.0 }
 0x4f4   : > { %1449 = vadd.xlane.f32.xlu1 %v1448_v26 }
 0x4f9   : > { %v3148_v52 = vpop.eup %2596 }
 0x4fa   : > { %v3150_v53 = vpop.eup %2598  ;;  %v1454_v54 = vsel %vm1236_vm3, %v3148_v52, 0.0 }
 0x505   : > { %948 = vrot.lane.b32.xlu1 %v3066_v27, %s2751_s0  ;;  %v1451_v27 = vsel %vm1236_vm3, %v3150_v53, 0.0 }
 0x509   : > { %950 = vrot.lane.b32.xlu0 %v3069_v28, %s2751_s0  ;;  %v945_v28 = vpop.permute.xlu0 %944 }
 0x528   : > { %1455 = vadd.xlane.f32.xlu0 %v1454_v54 }
 0x529   : > { %1452 = vadd.xlane.f32.xlu1 %v1451_v27 }
 0x580   : > { %v1447_v56 = vpop.xlane.xlu0 %1446 }
 0x581   : > { %v1450_v57 = vpop.xlane.xlu1 %1449  ;;  %2600 = vrcp.f32 %v1447_v56 }
 0x582   : > { %2602 = vrcp.f32 %v1450_v57 }
 0x584   : > { %v951_v58 = vpop.permute.xlu0 %950 }
 0x585   : > { %v972_v59 = vcombine.low %v947_v55, %v951_v58  ;;  %v973_v60 = vcombine.high %v947_v55, %v951_v58  ;;  %v949_v61 = vpop.permute.xlu1 %948 }
 0x586   : > { %v956_v62 = vcombine.low %v945_v28, %v949_v61  ;;  %v957_v63 = vcombine.high %v945_v28, %v949_v61 }
 0x587   : > { %v980_v0 = vrot.slane %v972_v59, %v3074_v40  ;;  %v987_v2 = vrot.slane %v973_v60, %v3074_v40 }
 0x588   : > { %v964_v3 = vrot.slane %v956_v62, %v3074_v40  ;;  %v971_v4 = vrot.slane %v957_v63, %v3074_v40 }
 0x58a   : > { %v988_v5 = vcombine.low %v964_v3, %v980_v0  ;;  %v989_v6 = vcombine.high %v964_v3, %v980_v0  ;;  %v1004_v7 = vcombine.low %v971_v4, %v987_v2  ;;  %v1005_v8 = vcombine.high %v971_v4, %v987_v2 }
 0x58b   : > { %v2601_v32 = vpop.eup %2600 }
 0x58c   : > { %v996_v10 = vrot.slane %v988_v5, %v3076_v46  ;;  %v1003_v11 = vrot.slane %v989_v6, %v3076_v46  ;;  %v1012_v12 = vrot.slane %v1004_v7, %v3076_v46  ;;  %v1019_v13 = vrot.slane %v1005_v8, %v3076_v46  ;;  %v2603_v35 = vpop.eup %2602 }
 0x58d   : > { %v1458_v41 = vmul.f32 %v2601_v32, %v3138_v43  ;;  %v1460_v42 = vmul.f32 %v2603_v35, %v3140_v44 }
 0x58e   : > { %v1160_v14 = vcombine.low %v996_v10, %v1003_v11  ;;  %v2337_v15 = vcombine.high %v996_v10, %v1003_v11  ;;  %v1176_v16 = vcombine.low %v1012_v12, %v1019_v13  ;;  %v2338_v17 = vcombine.high %v1012_v12, %v1019_v13 }
 0x58f   : > { %v1465_v50 = vpack.c.bf16 %v1458_v41, %v1458_v41  ;;  %v1466_v51 = vpack.c.bf16 %v1460_v42, %v1460_v42 }
 0x590   : > { %v1167_v18 = vrot.slane %v1160_v14, %v3074_v40  ;;  %v1175_v19 = vrot.slane %v2337_v15, %v3074_v40  ;;  %v1183_v20 = vrot.slane %v1176_v16, %v3074_v40  ;;  %v1191_v22 = vrot.slane %v2338_v17, %v3074_v40 }
 0x592   : > { %v1192_v23 = vcombine.low %v1167_v18, %v1175_v19  ;;  %v1193_v24 = vcombine.high %v1167_v18, %v1175_v19  ;;  %v1208_v25 = vcombine.low %v1183_v20, %v1191_v22  ;;  %v1209_v29 = vcombine.high %v1183_v20, %v1191_v22 }
 0x594   : > { %v1200_v30 = vrot.slane %v1192_v23, %v3076_v46  ;;  %v1207_v31 = vrot.slane %v1193_v24, %v3076_v46  ;;  %v1216_v33 = vrot.slane %v1208_v25, %v3076_v46  ;;  %v1223_v34 = vrot.slane %v1209_v29, %v3076_v46  ;;  %v2582_v25 = vld [vmem:[%s2983_s22] sm:$0xff]  }
 0x596   : > { %v1224_v36 = vcombine.low %v1200_v30, %v1216_v33  ;;  %v1225_v37 = vcombine.high %v1200_v30, %v1216_v33  ;;  %v1226_v38 = vcombine.low %v1207_v31, %v1223_v34  ;;  %v1227_v39 = vcombine.high %v1207_v31, %v1223_v34 }
 0x598   : > { %v1469_v45 = vpack.c.bf16 %v1224_v36, %v1224_v36  ;;  %v1470_v26 = vpack.c.bf16 %v1225_v37, %v1225_v37  ;;  %v1471_v48 = vpack.c.bf16 %v1226_v38, %v1226_v38  ;;  %v1472_v49 = vpack.c.bf16 %v1227_v39, %v1227_v39  ;;  %v2583_v37 = vld [vmem:[%s2983_s22 + $0x8] sm:$0xff]   ;;  %s2752_s22 = smov 16  }
 0x59a   : > { %v1478_v21 = vsel %vm1476_vm4, %v1469_v45, 0  ;;  %v1524_v47 = vsel %vm1476_vm4, %v1470_v26, 0  ;;  %v1570_v43 = vsel %vm1476_vm4, %v1471_v48, 0  ;;  %v1616_v44 = vsel %vm1476_vm4, %v1472_v49, 0 }
 0x59b   : > { %2438 = vmatpush3.bf16.msra.mxu1 %v1478_v21  ;;  %2444 = vmatpush3.bf16.msra.mxu0 %v1524_v47 }
 0x59c   : > { %2449 = vmatprep.subr.bf16.mxu1 %v2743_v9  ;;  %2455 = vmatprep.subr.bf16.mxu0 %v2743_v9 }
 0x59e   : > { %2440 = vmatmul.mubr.msk.bf16.vlgmr.msra.gmra.mrb[8].mxu1 %vm1236_vm3, %v1465_v50  ;;  %2446 = vmatmul.mubr.msk.bf16.vlgmr.msra.gmra.mrb[12].mxu0 %vm1236_vm3, %v1466_v51 }
 0x59f   : > { %2450 = vmatpush3.bf16.msra.mxu1 %v1570_v43  ;;  %2456 = vmatpush3.bf16.msra.mxu0 %v1616_v44 }
 0x5a0   : > { %2451 = vmatprep.mubr.msk.bf16.mxu1 %vm2744_vm2, %v2743_v9  ;;  %2457 = vmatprep.mubr.msk.bf16.mxu0 %vm2744_vm2, %v2743_v9 }
 0x5a1   : > { %2461 = vmatprep.subr.bf16.mxu1 %v2743_v9  ;;  %2469 = vmatprep.subr.bf16.mxu0 %v2743_v9 }
 0x5b5   : > { %v1456_v54 = vpop.xlane.xlu0 %1455 }
 0x5b6   : > { %2604 = vrcp.f32 %v1456_v54  ;;  %v1453_v27 = vpop.xlane.xlu1 %1452 }
 0x5b7   : > { %2606 = vrcp.f32 %v1453_v27 }
 0x5c0   : > { %v2605_v28 = vpop.eup %2604 }
 0x5c1   : > { %v2607_v55 = vpop.eup %2606  ;;  %v1464_v56 = vmul.f32 %v2605_v28, %v3148_v52 }
 0x5c2   : > { %v1462_v57 = vmul.f32 %v2607_v55, %v3150_v53 }
 0x5c3   : > { %v1468_v58 = vpack.c.bf16 %v1464_v56, %v1464_v56 }
 0x5c4   : > { %v1467_v59 = vpack.c.bf16 %v1462_v57, %v1462_v57 }
 0x5c5   : > { %2458 = vmatmul.mubr.msk.bf16.vlgmr.msra.gmra.mrb[16].mxu0 %vm1236_vm3, %v1468_v58 }
 0x5c6   : > { %2452 = vmatmul.mubr.msk.bf16.vlgmr.msra.gmra.mrb[12].mxu1 %vm1236_vm3, %v1467_v59  ;;  %2473 = vmatprep.mubr.msk.bf16.mxu0 %vm2744_vm2, %v2743_v9  ;;  %v685_v59 = vld [vmem:[#allocation2] sm:$0xff] }
 0x5c7   : > { %2465 = vmatprep.mubr.msk.bf16.mxu1 %vm2744_vm2, %v2743_v9  ;;  %2462 = vmatpush3.bf16.msra.mxu1 %v2582_v25 }
 0x5c8   : > { %2463 = vmatprep.subr.bf16.mxu1 %v2743_v9 }
 0x5cb   : > { %2464 = vmatpush3.bf16.msra.mxu1 %v2583_v37 }
 0x5cc   : > { %2477 = vmatprep.subr.bf16.mxu1 %v2743_v9 }
 0x671   : > { %v1514_v60 = vpop.f32.mrb[8].mxu1  ;;  %v1560_v61 = vpop.f32.mrb[12].mxu0 }
 0x672   : > { %v2441_v62 = vpop.f32.mrb[9].mxu1  ;;  %v2447_v63 = vpop.f32.mrb[13].mxu0 }
 0x673   : > { %v1517_v0 = vpop.f32.mrb[10].mxu1  ;;  %v1563_v52 = vpop.f32.mrb[14].mxu0 }
 0x674   : > { %v2442_v2 = vpop.f32.mrb[11].mxu1  ;;  %v2448_v53 = vpop.f32.mrb[15].mxu0 }
 0x698   : > { %v1652_v3 = vpop.f32.mrb[16].mxu0 }
 0x699   : > { %v1606_v4 = vpop.f32.mrb[12].mxu1  ;;  %v1674_v5 = vcombine.low %v1560_v61, %v1652_v3  ;;  %v1675_v6 = vcombine.high %v1560_v61, %v1652_v3  ;;  %v2459_v7 = vpop.f32.mrb[17].mxu0 }
 0x69a   : > { %v1658_v8 = vcombine.low %v1514_v60, %v1606_v4  ;;  %v1659_v10 = vcombine.high %v1514_v60, %v1606_v4  ;;  %v2453_v11 = vpop.f32.mrb[13].mxu1  ;;  %v1655_v12 = vpop.f32.mrb[18].mxu0  ;;  %v2585_v7 = vld [vmem:[%s2988_s18 + $0x8] sm:$0xff]  }
 0x69b   : > { %v1682_v13 = vrot.slane %v1674_v5, %v3074_v40  ;;  %v1689_v14 = vrot.slane %v1675_v6, %v3074_v40  ;;  %v1609_v15 = vpop.f32.mrb[14].mxu1  ;;  %v2460_v16 = vpop.f32.mrb[19].mxu0  ;;  %v2584_v6 = vld [vmem:[%s2988_s18] sm:$0xff]  }
 0x69c   : > { %v1666_v17 = vrot.slane %v1658_v8, %v3074_v40  ;;  %v1673_v18 = vrot.slane %v1659_v10, %v3074_v40  ;;  %v2454_v19 = vpop.f32.mrb[15].mxu1  ;;  %2470 = vmatpush3.bf16.msra.mxu0 %v2584_v6  ;;  %v2586_v8 = vld [vmem:[%s2994_s27] sm:$0xff]   ;;  %v2587_v10 = vld [vmem:[%s2994_s27 + $0x8] sm:$0xff]  }
 0x69d   : > { %2471 = vmatprep.subr.bf16.mxu0 %v2743_v9  ;;  %v2352_v15 = vld [vmem:[%s668_s3] ss:$0 sm:$0xff] }
 0x69e   : > { %v1690_v20 = vcombine.low %v1666_v17, %v1682_v13  ;;  %v1691_v22 = vcombine.high %v1666_v17, %v1682_v13  ;;  %v1706_v23 = vcombine.low %v1673_v18, %v1689_v14  ;;  %v1707_v24 = vcombine.high %v1673_v18, %v1689_v14  ;;  %v2353_v17 = vld [vmem:[%s671_s20] ss:$0 sm:$0xff] }
 0x6a0   : > { %v1698_v29 = vrot.slane %v1690_v20, %v3076_v46  ;;  %v1705_v30 = vrot.slane %v1691_v22, %v3076_v46  ;;  %v1714_v31 = vrot.slane %v1706_v23, %v3076_v46  ;;  %v1721_v32 = vrot.slane %v1707_v24, %v3076_v46  ;;  %2472 = vmatpush3.bf16.msra.mxu0 %v2585_v7  ;;  %v2588_v22 = vld [vmem:[%s2994_s27 + $0x10] sm:$0xff]   ;;  %v2589_v23 = vld [vmem:[%s2994_s27 + $0x18] sm:$0xff]   ;;  %v2354_v24 = vld [vmem:[%s3397_s29] ss:$0 sm:$0xff]  ;;  %s3398_s27 = scalar_lea.vmem %s3335_s6, %s2967_s13 }
 0x6a2   : > { %v1726_v33 = vcombine.low %v1698_v29, %v1705_v30  ;;  %v2347_v34 = vcombine.high %v1698_v29, %v1705_v30  ;;  %v1742_v35 = vcombine.low %v1714_v31, %v1721_v32  ;;  %v2348_v36 = vcombine.high %v1714_v31, %v1721_v32 }
 0x6a4   : > { %v1733_v38 = vrot.slane %v1726_v33, %v3074_v40  ;;  %v1741_v39 = vrot.slane %v2347_v34, %v3074_v40  ;;  %v1749_v41 = vrot.slane %v1742_v35, %v3074_v40  ;;  %v1757_v42 = vrot.slane %v2348_v36, %v3074_v40 }
 0x6a6   : > { %v1759_v45 = vcombine.high %v1733_v38, %v1741_v39  ;;  %v1775_v26 = vcombine.high %v1749_v41, %v1757_v42  ;;  %v1758_v21 = vcombine.low %v1733_v38, %v1741_v39  ;;  %v1774_v47 = vcombine.low %v1749_v41, %v1757_v42 }
 0x6a8   : > { %v1773_v48 = vrot.slane %v1759_v45, %v3076_v46  ;;  %v1789_v49 = vrot.slane %v1775_v26, %v3076_v46  ;;  %v1766_v50 = vrot.slane %v1758_v21, %v3076_v46  ;;  %v1782_v51 = vrot.slane %v1774_v47, %v3076_v46 }
 0x6aa   : > { %v1792_v43 = vcombine.low %v1773_v48, %v1789_v49  ;;  %v1791_v44 = vcombine.high %v1766_v50, %v1782_v51  ;;  %v1793_v54 = vcombine.high %v1773_v48, %v1789_v49  ;;  %v1790_v27 = vcombine.low %v1766_v50, %v1782_v51 }
 0x6ac   : > { %1799 = vrot.lane.b32.xlu1 %v1792_v43, %s2752_s22  ;;  %1795 = vrot.lane.b32.xlu0 %v1791_v44, %s2753_s19 }
 0x6b0   : > { %1803 = vrot.lane.b32.xlu1 %v1793_v54, %s2754_s30  ;;  %v2365_v54 = vld [vmem:[%s3399_s5] ss:$0 sm:$0xff] (!%p2364_p0) }
 0x71e   : > { %v1800_v40 = vpop.permute.xlu1 %1799  ;;  %v1796_v28 = vpop.permute.xlu0 %1795 }
 0x71f   : > { %v1806_v55 = vsel %vm1236_vm3, %v1790_v27, %v1796_v28  ;;  %v2095_v28 = vld [vmem:[%s3019_s25] sm:$0xff] (!%p2364_p0) }
 0x720   : > { %v1808_v57 = vsel %vm1807_vm5, %v1806_v55, %v1800_v40  ;;  %v2366_v40 = vld [vmem:[%s3400_s28] ss:$0 sm:$0xff] (!%p2364_p0)  ;;  %vm2096_vm8 = vcmp.ge.f32.partialorder (!%p2364_p0), %v2095_v28, 0.05 }
 0x722   : > { %v1804_v56 = vpop.permute.xlu1 %1803 }
 0x723   : > { %v1810_v58 = vsel %vm1809_vm6, %v1808_v57, %v1804_v56 }
 0x724   : > { %v1815_v46 = vpack.c.bf16 %v1810_v58, %v1810_v58 }
 0x726   : > { %2466 = vmatmul.mubr.msk.bf16.vlgmr.msra.gmra.mrb[16].mxu1 %vm689_vm1, %v1815_v46 }
 0x727   : > { %2485 = vmatprep.mubr.msk.bf16.mxu1 %vm2744_vm2, %v2743_v9  ;;  %2478 = vmatpush3.bf16.msra.mxu1 %v2586_v8 }
 0x728   : > { %2479 = vmatprep.subr.bf16.mxu1 %v2743_v9 }
 0x72b   : > { %2480 = vmatpush3.bf16.msra.mxu1 %v2587_v10 }
 0x72c   : > { %2481 = vmatprep.subr.bf16.mxu1 %v2743_v9 }
 0x72f   : > { %2482 = vmatpush3.bf16.msra.mxu1 %v2588_v22 }
 0x730   : > { %2483 = vmatprep.subr.bf16.mxu1 %v2743_v9  ;;  %v2358_v9 = vld [vmem:[%s3398_s27] ss:$0 sm:$0xff] }
 0x733   : > { %2484 = vmatpush3.bf16.msra.mxu1 %v2589_v23 }
 0x7f9   : > { %v1865_v60 = vpop.f32.mrb[16].mxu1 }
 0x7fa   : > { %v3220_v61 = vadd.f32 %v1865_v60, %v685_v59  ;;  %v2467_v62 = vpop.f32.mrb[17].mxu1 }
 0x7fb   : > { %v1868_v63 = vpop.f32.mrb[18].mxu1 }
 0x7fc   : > { %2054 = vst.msk [vmem:[#allocation2] sm:$0xff] %vm689_vm1, %v3220_v61  ;;  %v2468_v0 = vpop.f32.mrb[19].mxu1  ;;  %v1874_v52 = vsel %vm689_vm1, %v3220_v61, 0.0 }
 0x7fd   : > { %1875 = vadd.xlane.f32.xlu0 %v1874_v52 }
 0x88a   : > { %v1876_v2 = vpop.xlane.xlu0 %1875 }
 0x88b   : > { %v1877_v53 = vmul.f32 0.03125, %v1876_v2 }
 0x88d   : > { %v1878_v3 = vsub.f32 %v3220_v61, %v1877_v53 }
 0x88f   : > { %v1879_v4 = vmul.f32 %v1878_v3, %v1878_v3 }
 0x891   : > { %v1880_v5 = vsel %vm689_vm1, %v1879_v4, 0.0 }
 0x892   : > { %1881 = vadd.xlane.f32.xlu1 %v1880_v5 }
 0x91f   : > { %v1882_v11 = vpop.xlane.xlu1 %1881 }
 0x920   : > { %v1883_v12 = vmul.f32 0.03125, %v1882_v11 }
 0x922   : > { %v1884_v13 = vadd.f32 1e-12, %v1883_v12 }
 0x924   : > { %2608 = vrsqrt.f32 %v1884_v13 }
 0x92e   : > { %v2609_v14 = vpop.eup %2608 }
 0x92f   : > { %v1886_v16 = vmul.f32 %v2609_v14, %v1878_v3 }
 0x931   : > { %v1893_v18 = vmul.f32 %v2352_v15, %v1886_v16 }
 0x933   : > { %v1900_v19 = vadd.f32 %v2353_v17, %v1893_v18 }
 0x935   : > { %v1905_v20 = vpack.c.bf16 %v1900_v19, %v1900_v19 }
 0x937   : > { %2474 = vmatmul.mubr.msk.bf16.vlgmr.msra.gmra.mrb[20].mxu0 %vm689_vm1, %v1905_v20 }
 0xa0a   : > { %v1962_v25 = vpop.f32.mrb[20].mxu0 }
 0xa0b   : > { %v1963_v29 = vadd.f32 %v2354_v24, %v1962_v25  ;;  %v2475_v30 = vpop.f32.mrb[21].mxu0 }
 0xa0c   : > { %v1965_v31 = vpop.f32.mrb[22].mxu0 }
 0xa0d   : > { %v1968_v32 = vmax.f32 %v1963_v29, 0.0  ;;  %v2476_v33 = vpop.f32.mrb[23].mxu0 }
 0xa0f   : > { %v1977_v34 = vpack.c.bf16 %v1968_v32, %v1968_v32 }
 0xa11   : > { %2486 = vmatmul.mubr.msk.bf16.vlgmr.msra.gmra.mrb[20].mxu1 %vm2009_vm7, %v1977_v34 }
 0xae3   : > { %2059 = sbr.rel (%p2364_p0) target bundleno = 3226 (0xc9a), region = 88 }
 0xae4   : > { %v2047_v35 = vpop.f32.mrb[20].mxu1 }
 0xae5   : > { %v2048_v36 = vadd.f32 %v2358_v9, %v2047_v35  ;;  %v2487_v37 = vpop.f32.mrb[21].mxu1 }
 0xae6   : > { %v2050_v38 = vpop.f32.mrb[22].mxu1 }
 0xae7   : > { %v2053_v39 = vadd.f32 %v2048_v36, %v3024_v1  ;;  %v2488_v41 = vpop.f32.mrb[23].mxu1 }
 0xae9   : > { %2055 = vst.msk [vmem:[#allocation3] sm:$0xff] %vm689_vm1, %v2053_v39  ;;  %2061 = vrot.lane.b32.xlu0 (!%p2364_p0), %v2053_v39, %s2755_s4 }
 0xb5b   : > { %v2062_v42 = vpop.permute.xlu0 %2061 }
 0xb5c   : > { %v2064_v45 = vsel %vm689_vm1, %v3220_v61, %v2062_v42 }
 0xb5d   : > { %v2067_v26 = vsel %vm2009_vm7, %v2064_v45, 0.0 }
 0xb5e   : > { %2068 = vadd.xlane.f32.xlu0 %v2067_v26 }
 0xbeb   : > { %v2069_v21 = vpop.xlane.xlu0 %2068 }
 0xbec   : > { %v2071_v47 = vmul.f32 0.015625, %v2069_v21 }
 0xbee   : > { %v2072_v48 = vsub.f32 %v2064_v45, %v2071_v47 }
 0xbf0   : > { %v2073_v1 = vmul.f32 %v2072_v48, %v2072_v48 }
 0xbf2   : > { %v2074_v49 = vsel %vm2009_vm7, %v2073_v1, 0.0 }
 0xbf3   : > { %2075 = vadd.xlane.f32.xlu1 %v2074_v49 }
 0xc80   : > { %v2076_v50 = vpop.xlane.xlu1 %2075 }
 0xc81   : > { %v2077_v51 = vmul.f32 0.015625, %v2076_v50 }
 0xc83   : > { %v2078_v43 = vadd.f32 1e-12, %v2077_v51 }
 0xc85   : > { %2610 = vrsqrt.f32 %v2078_v43 }
 0xc8f   : > { %v2611_v44 = vpop.eup %2610 }
 0xc90   : > { %v2080_v27 = vmul.f32 %v2611_v44, %v2072_v48 }
 0xc92   : > { %v2087_v55 = vmul.f32 %v2365_v54, %v2080_v27 }
 0xc94   : > { %v2094_v56 = vadd.f32 %v2366_v40, %v2087_v55 }
 0xc96   : > { %v2097_v57 = vmul.f32 1.0526316, %v2094_v56 }
 0xc98   : > { %v2098_v58 = vsel %vm2096_vm8, %v2097_v57, 0.0 }
 0xc99   : > { %2099 = vst.msk [vmem:[%s3021_s1] sm:$0xff] %vm2009_vm7, %v2098_v58 }
 0xc9a PF: > { %s3401_s14 = sld [smem:[#allocation13_spill]]  ;;  %s3402_s26 = sld [smem:[#allocation22_spill]] }
 0xc9b   : > { %s3403_s0 = sld [smem:[#allocation19_spill]]  ;;  %s3404_s18 = sld [smem:[#allocation32_spill]] }
 0xc9c   : > { %s2114_s17 = sshll.u32 %s3021_s1, 4  ;;  %s2756_s3 = smov [#allocation7]   ;;  %s2115_s17 = int_to_ptr.vmem [resolvable:$true] %s2114_s17 }
 0xc9d   : > { %s2642_s12 = scalar_lea.vmem %s2115_s17, 128  ;;  %s2646_s11 = sshll.u32 %s2756_s3, 4  ;;  %s2647_s11 = int_to_ptr.vmem [resolvable:$false] %s2646_s11 }
 0xc9e   : > { %p2643_p7 = scmp.ne.s32.totalorder %s2115_s17, %s2642_s12  ;;  %s2648_s29 = scalar_lea.vmem %s2647_s11, 256 }
 0xc9f   : > { %p2649_p3 = scmp.lt.s32.totalorder %s2115_s17, %s2647_s11  ;;  %p2650_p8 = scmp.lt.s32.totalorder %s2648_s29, %s2642_s12 }
 0xca0   : > { %s2368_s22 = sshll.u32 %s3401_s14, 7  ;;  %s2101_s25 = scalar_lea.sflag [#allocation6], %s3402_s26 }
 0xca1   : > { %s3405_s23 = smov %s3404_s18  ;;  %s3280_s15 = scalar_lea.hbm %s3404_s18, %s2368_s22 }
 0xca2   : > { %p3406_p13 = scmp.ne.s32.totalorder %s3403_s0, 0  ;;  %p2651_p12 = por %p2650_p8, %p2649_p3 }
 0xca4   : > { %p2644_p4 = pnand %p2643_p7, %p3406_p13 }
 0xca6   : > { %p2645_p6 = pneg %p2644_p4 }
 0xca8   : > { %p2652_p1 = pnand %p2651_p12, %p2645_p6 }
 0xcaa   : > { %2655 = shalt.err (!%p2652_p1)
}
 0xcab   : > { %s2656_s1 = scalar_lea.hbm %s3280_s15, 128  ;;  %s2660_s27 = scalar_lea.hbm %s3405_s23, 256 }
 0xcac   : > { %p2657_p2 = scmp.ne.s32.totalorder %s3280_s15, %s2656_s1  ;;  %p2661_p11 = scmp.lt.u32.totalorder %s3280_s15, %s3405_s23 }
 0xcad   : > { %p2662_p9 = scmp.lt.u32.totalorder %s2660_s27, %s2656_s1  ;;  %p2664_p7 = scmp.lt.u32.totalorder %s2656_s1, %s3280_s15 }
 0xcae   : > { %p2658_p5 = pnand %p2657_p2, %p3406_p13 }
 0xcaf   : > { %p2663_p0 = por %p2662_p9, %p2661_p11 }
 0xcb0   : > { %p2659_p10 = pneg %p2658_p5 }
 0xcb1   : > { %p2665_p4 = por %p2664_p7, %p2663_p0 }
 0xcb3   : > { %p2666_p6 = pnand %p2665_p4, %p2659_p10 }
 0xcb5   : > { %2669 = shalt.err (!%p2666_p6)
}
 0xcb6   : > { %2491 = dma.vmem_to_hbm [thread:$0]  (%p3406_p13), %s2115_s17, 128, %s3280_s15, %s2101_s25  }
 0xcb7 PF: > { %s3407_s13 = sld [smem:[#allocation16_spill]]  ;;  %s3408_s5 = sld [smem:[#allocation10_spill]] }
 0xcb8   : > { %s3409_s24 = sld [smem:[#allocation20_spill]] }
 0xcbd   : > { %p2502_p3 = scmp.ge.s32.totalorder %s3407_s13, 2  ;;  %s2126_s21 = sand.u32 1, %s3408_s5  }
 0xcbe   : > { %p3410_p8 = scmp.ne.s32.totalorder %s3409_s24, 0  ;;  %s2127_s28 = scalar_lea.sflag [#allocation6], %s2126_s21 }
 0xcc0   : > { %p2498_p12 = pnand %p2502_p3, %p3410_p8 }
 0xcc2   : > { %2707 = dma.done.wait (!%p2498_p12), %s2127_s28, 128  }
 0xcc3   : > { %2709 = vsyncadd (!%p2498_p12), %s2127_s28, 4294967168  ;;  %s30_s20 = sadd.s32 1, %s3407_s13   ;;  %s3411_s29 = sld [smem:[#allocation11_spill]] }
 0xcc4   : > { %p27_p1 = scmp.ge.s32.totalorder %s30_s20, 6   ;;  %s3412_s30 = sld [smem:[#allocation12_spill]] }
 0xcc5   : > { %s3413_s15 = sld [smem:[#allocation21_spill]]  ;;  %s3414_s16 = sld [smem:[#allocation14_spill]] }
 0xcc6   : > { %s3415_s17 = sld [smem:[#allocation15_spill]]  ;;  %s3416_s18 = sld [smem:[#allocation17_spill]] }
 0xcc7   : > { %s3417_s19 = sld [smem:[#allocation18_spill]]  ;;  %29 = sbr.rel (!%p27_p1) target bundleno = 18 (0x12), region = 162 }
 0xcce   :  { %2132 = vsyncpa [#allocation5], 1 }
 0xccf   :  { %2134 = vsyncpa [#allocation5 + $0x1], 1 }
 0xcd0   :  { %2135 = vsyncpa [#allocation6], 1 }
 0xcd1   :  { %2137 = vsyncpa [#allocation6 + $0x1], 1 }

</bundles_post_ra>
